<compile_context>
chip_gen: v7x
topology: tpu7x:2x2x1
jax: 0.10.0
libtpu: 0.0.40
codegen_flags: <defaults>
</compile_context>

<pallas_src>
import jax
import jax.numpy as jnp
from jax.experimental import pallas as pl
from jax.experimental.pallas import tpu as pltpu


_TARGET_BLOCK_BYTES = 2 * 1024 * 1024   # ~2 MiB per streamed block
_MAX_LANE_TILE = 8192                   # cap on lanes per tile


# -----------------------------------------------------------------------------
# Parameter helpers
# -----------------------------------------------------------------------------
def xavier_uniform(key, fan_in, fan_out):
    # matches nn.init.xavier_uniform_ for a (fan_out, fan_in) Linear weight;
    # stored transposed (fan_in, fan_out) so the reference does x @ W.
    limit = (6.0 / (fan_in + fan_out)) ** 0.5
    return jax.random.uniform(key, (fan_in, fan_out), jnp.float32,
                              minval=-limit, maxval=limit)


def make_params(key, in_channels, num_levels):
    hidden = in_channels // 16
    params = []
    for _ in range(num_levels):
        k1, k2, k3, key = jax.random.split(key, 4)
        w1 = xavier_uniform(k1, in_channels, hidden)        # (C, Hd)
        b1 = jnp.zeros((1, hidden), jnp.float32)
        w2 = xavier_uniform(k2, hidden, in_channels)        # (Hd, C)
        b2 = jnp.zeros((1, in_channels), jnp.float32)
        w3 = xavier_uniform(k3, hidden, 1)                  # (Hd, 1)
        b3 = jnp.zeros((1, 1), jnp.float32)
        params.append((w1, b1, w2, b2, w3, b3))
    return params


# -----------------------------------------------------------------------------
# Generation-aware VMEM budget / tiling helpers
# -----------------------------------------------------------------------------
def _tpu_vmem_limit_bytes():
    cap = None
    try:
        cap = getattr(pltpu.get_tpu_info(), "vmem_capacity_bytes", None)
    except Exception:
        cap = None
    if not cap or cap <= 0:
        cap = 64 * 1024 * 1024            # unknown -> assume v7x-sized VMEM
    if cap >= 100 * 1024 * 1024:          # v5e / v6e: 128 MiB physical
        return 96 * 1024 * 1024
    return min((cap * 3) // 4, 48 * 1024 * 1024)   # v7x: 64 MiB -> 48 MiB


def _choose_lane_tile(hw, c, target_bytes):
    """Pick a lane tile T (multiple of 128, or the full extent) and n_tiles."""
    t = (target_bytes // (c * 4)) // 128 * 128
    t = max(128, min(t, _MAX_LANE_TILE))
    if t >= hw:
        return hw, 1                      # single full-extent tile (always legal)
    return t, -(-hw // t)                 # cdiv; tail tile is masked


def _stash_vmem_need_bytes(c, hd, t, n_tiles, p):
    # x stash + double-buffered in/out blocks + accumulator + scale/t + weights.
    lanes = n_tiles * t + 4 * t + p + 2
    need = 4 * c * lanes
    need += 4 * 4 * (hd * c + c + hd + 1)
    return need + 2 * 1024 * 1024         # slack for compiler internals


# -----------------------------------------------------------------------------
# Fused per-level kernel (two phases over one grid)
# -----------------------------------------------------------------------------
def _make_level_kernel(*, C, HW, T, n_tiles, P, stash):
    inv_hw = 1.0 / float(HW)
    n_chunks = T // P
    needs_mask = (n_tiles * T) != HW

    def kernel(x_ref, w1t_ref, b1_ref, w2t_ref, b2_ref, w3t_ref, b3_ref,
               o_ref, *scratch):
        if stash:
            x_vmem, acc_ref, scale_ref, t_ref = scratch
        else:
            acc_ref, scale_ref, t_ref = scratch
        phase = pl.program_id(1)
        k = pl.program_id(2)

        # ---- phase 0: stream x once, (optionally) stash, pool, tiny FCs ----
        @pl.when(phase == 0)
        def _pool_phase():
            @pl.when(k == 0)
            def _init():
                acc_ref[...] = jnp.zeros_like(acc_ref)

            xt = x_ref[0]                                     # (C, T)
            if stash:
                if n_tiles == 1:
                    x_vmem[...] = xt
                else:
                    start = pl.multiple_of(k * T, T)
                    x_vmem[:, pl.ds(start, T)] = xt
            if needs_mask:
                # Tail tile extends past HW: zero the out-of-bounds lanes
                # before accumulating (select, so NaN garbage cannot leak in).
                lane = jax.lax.broadcasted_iota(jnp.int32, (C, T), 1)
                xt = jnp.where(k * T + lane < HW, xt, 0.0)

            # VPU partial sums over 128-lane chunks; the single cross-lane
            # (XLU) reduce happens only once, in the finalize below.
            partial = xt[:, 0:P]
            for j in range(1, n_chunks):
                partial = partial + xt[:, j * P:(j + 1) * P]
            acc_ref[...] += partial

            @pl.when(k == n_tiles - 1)
            def _fc():
                pooled = jnp.sum(acc_ref[...], axis=-1,
                                 keepdims=True) * inv_hw                # (C, 1)
                h = jnp.dot(w1t_ref[...], pooled,
                            preferred_element_type=jnp.float32) + b1_ref[...]   # (Hd,1)
                scale_ref[...] = jnp.dot(
                    w2t_ref[...], h,
                    preferred_element_type=jnp.float32) + b2_ref[...]  # (C,1) == 1+s
                tval = jnp.dot(
                    w3t_ref[...], h,
                    preferred_element_type=jnp.float32) + b3_ref[...]  # (1,1)
                t_ref[...] = jnp.broadcast_to(tval, (C, 1))

        # ---- phase 1: pure FMA apply, streamed back to HBM ------------------
        @pl.when(phase == 1)
        def _apply_phase():
            if stash:
                if n_tiles == 1:
                    xt = x_vmem[...]
                else:
                    start = pl.multiple_of(k * T, T)
                    xt = x_vmem[:, pl.ds(start, T)]
            else:
                xt = x_ref[0]
            o_ref[...] = (xt * scale_ref[...] + t_ref[...])[None]

    return kernel


def wfpn_pretreat_level(x, level_params, *, target_block_bytes=None,
                        force_stream=False, vmem_limit_bytes=None):
    B, C, H, W = x.shape
    HW = H * W
    w1, b1, w2, b2, w3, b3 = level_params
    Hd = w1.shape[1]

    # Column-oriented weights (C stays on the sublane axis end to end, so the
    # kernel never needs an in-kernel transpose).  The "+1" of out = x*(1+s)+t
    # is folded into the fc2 bias -> the apply phase is a pure FMA.
    w1t = jnp.asarray(w1, jnp.float32).T                       # (Hd, C)
    b1c = jnp.asarray(b1, jnp.float32).reshape(-1, 1)          # (Hd, 1)
    w2t = jnp.asarray(w2, jnp.float32).T                       # (C, Hd)
    b2c = jnp.asarray(b2, jnp.float32).reshape(-1, 1) + 1.0    # (C, 1)
    w3t = jnp.asarray(w3, jnp.float32).T                       # (1, Hd)
    b3c = jnp.asarray(b3, jnp.float32).reshape(1, 1)           # (1, 1)

    if vmem_limit_bytes is None:
        vmem_limit_bytes = _tpu_vmem_limit_bytes()
    if target_block_bytes is None:
        target_block_bytes = _TARGET_BLOCK_BYTES

    T, n_tiles = _choose_lane_tile(HW, C, target_block_bytes)
    P = 128 if (T % 128 == 0) else T
    stash = (not force_stream) and (
        _stash_vmem_need_bytes(C, Hd, T, n_tiles, P)
        <= (vmem_limit_bytes * 4) // 5)

    kernel = _make_level_kernel(C=C, HW=HW, T=T, n_tiles=n_tiles, P=P,
                                stash=stash)

    if stash:
        # Phase 0 walks the tiles (the single HBM read); phase 1 keeps the x
        # block index parked at the last tile so no re-fetch happens.
        x_index = lambda b, p, k: (b, 0, k * (1 - p) + (n_tiles - 1) * p)
    else:
        x_index = lambda b, p, k: (b, 0, k)      # re-streamed in phase 1

    def _const(a):
        nd = a.ndim
        return pl.BlockSpec(a.shape, lambda b, p, k, _nd=nd: (0,) * _nd)

    scratch = []
    if stash:
        scratch.append(pltpu.VMEM((C, n_tiles * T), jnp.float32))  # x stash
    scratch += [pltpu.VMEM((C, P), jnp.float32),      # pooled-sum accumulator
                pltpu.VMEM((C, 1), jnp.float32),      # 1 + s (per-channel)
                pltpu.VMEM((C, 1), jnp.float32)]      # t     (per-sample)

    x3 = x.reshape(B, C, HW).astype(jnp.float32)
    out3 = pl.pallas_call(
        kernel,
        out_shape=jax.ShapeDtypeStruct((B, C, HW), jnp.float32),
        grid=(B, 2, n_tiles),
        in_specs=[pl.BlockSpec((1, C, T), x_index),
                  _const(w1t), _const(b1c), _const(w2t),
                  _const(b2c), _const(w3t), _const(b3c)],
        out_specs=pl.BlockSpec((1, C, T), lambda b, p, k: (b, 0, k * p)),
        scratch_shapes=scratch,
        compiler_params=pltpu.CompilerParams(
            dimension_semantics=("parallel", "arbitrary", "arbitrary"),
            vmem_limit_bytes=int(vmem_limit_bytes)),
    )(x3, w1t, b1c, w2t, b2c, w3t, b3c)
    return out3.reshape(B, C, H, W)


def wfpn_pretreat(inputs, params, **kwargs):
    assert len(inputs) == len(params)
    return tuple(wfpn_pretreat_level(x, p, **kwargs)
                 for x, p in zip(inputs, params))


# -----------------------------------------------------------------------------
# Plain-JAX reference of the PyTorch forward (for correctness checking)
# -----------------------------------------------------------------------------
def _reference_level(x, w1, b1, w2, b2, w3, b3):
    B, C, H, W = x.shape
    pooled = jnp.mean(x, axis=(2, 3))
    h = pooled @ w1 + b1
    s = h @ w2 + b2
    t = h @ w3 + b3
    return x + x * s.reshape(B, C, 1, 1) + t.reshape(B, 1, 1, 1)


if __name__ == "__main__":
    B, C = 2, 64                   # in_channels divisible by 16 -> hidden = 4
    level_hw = [(32, 32), (16, 16), (8, 8), (24, 17)]   # last: HW=408, not /128
    num_levels = len(level_hw)

    key = jax.random.PRNGKey(0)
    kx, kp = jax.random.split(key)
    inputs = []
    for (h, w) in level_hw:
        kx, sub = jax.random.split(kx)
        inputs.append(jax.random.normal(sub, (B, C, h, w), jnp.float32))
    params = make_params(kp, C, num_levels)
    refs = [_reference_level(x, *p) for x, p in zip(inputs, params)]

    def _check(outs, tag):
        for x, o, r in zip(inputs, outs, refs):
            assert o.shape == x.shape, tag
            assert jnp.allclose(o, r, atol=3e-5, rtol=3e-5), \
                f"mismatch vs reference ({tag})"

    # 1) production settings: generation-aware VMEM budget, ~2 MiB blocks;
    #    all test levels take the fused 1-read/1-write (VMEM-stash) path.
    outs = jax.block_until_ready(wfpn_pretreat(inputs, params))
    _check(outs, "default")

    # 2) tiny blocks: exercises the multi-tile accumulation and the masked
    #    tail tile while still using the stash (1R+1W) path.
    outs = jax.block_until_ready(
        wfpn_pretreat(inputs, params, target_block_bytes=64 * 1024))
    _check(outs, "tiled-stash")

    # 3) forced streaming: exercises the 2-read/1-write path used for levels
    #    that do not fit in VMEM.
    outs = jax.block_until_ready(
        wfpn_pretreat(inputs, params, target_block_bytes=64 * 1024,
                      force_stream=True))
    _check(outs, "streamed")

    print("KERNEL_OK")
</pallas_src>

<mosaic_0001>
module attributes {stable_mosaic.version = 11 : i64} {
  func.func @kernel(%arg0: i32, %arg1: i32, %arg2: i32, %arg3: memref<1x64x1024xf32, #tpu.memory_space<vmem>>, %arg4: memref<4x64xf32, #tpu.memory_space<vmem>>, %arg5: memref<4x1xf32, #tpu.memory_space<vmem>>, %arg6: memref<64x4xf32, #tpu.memory_space<vmem>>, %arg7: memref<64x1xf32, #tpu.memory_space<vmem>>, %arg8: memref<1x4xf32, #tpu.memory_space<vmem>>, %arg9: memref<1x1xf32, #tpu.memory_space<vmem>>, %arg10: memref<1x64x1024xf32, #tpu.memory_space<vmem>>, %arg11: memref<64x1024xf32, #tpu.memory_space<vmem>>, %arg12: memref<64x128xf32, #tpu.memory_space<vmem>>, %arg13: memref<64x1xf32, #tpu.memory_space<vmem>>, %arg14: memref<64x1xf32, #tpu.memory_space<vmem>>) attributes {dimension_semantics = [#tpu.dimension_semantics<parallel>, #tpu.dimension_semantics<arbitrary>, #tpu.dimension_semantics<arbitrary>], iteration_bounds = array<i64: 2, 2, 1>, scalar_prefetch = 0 : i64, scratch_operands = 4 : i64, tpu.core_type = #tpu.core_type<tc>, window_params = [{transform_indices = @transform_0, window_bounds = array<i64: 1, 64, 1024>}, {pipeline_mode = #tpu.pipeline_mode<synchronous>, transform_indices = @transform_1, window_bounds = array<i64: 4, 64>}, {pipeline_mode = #tpu.pipeline_mode<synchronous>, transform_indices = @transform_2, window_bounds = array<i64: 4, 1>}, {pipeline_mode = #tpu.pipeline_mode<synchronous>, transform_indices = @transform_3, window_bounds = array<i64: 64, 4>}, {pipeline_mode = #tpu.pipeline_mode<synchronous>, transform_indices = @transform_4, window_bounds = array<i64: 64, 1>}, {pipeline_mode = #tpu.pipeline_mode<synchronous>, transform_indices = @transform_5, window_bounds = array<i64: 1, 4>}, {pipeline_mode = #tpu.pipeline_mode<synchronous>, transform_indices = @transform_6, window_bounds = array<i64: 1, 1>}, {transform_indices = @transform_7, window_bounds = array<i64: 1, 64, 1024>}]} {
    %c0_i32 = arith.constant 0 : i32
    %0 = arith.cmpi eq, %arg1, %c0_i32 : i32
    %1 = arith.extui %0 : i1 to i32
    %c0_i32_0 = arith.constant 0 : i32
    %2 = arith.cmpi ne, %1, %c0_i32_0 : i32
    scf.if %2 {
      %c0_i32_2 = arith.constant 0 : i32
      %6 = arith.cmpi eq, %arg2, %c0_i32_2 : i32
      %7 = arith.extui %6 : i1 to i32
      %c0_i32_3 = arith.constant 0 : i32
      %8 = arith.cmpi ne, %7, %c0_i32_3 : i32
      scf.if %8 {
        %cst = arith.constant 0.000000e+00 : f32
        %33 = vector.broadcast %cst : f32 to vector<64x128xf32>
        %c0_14 = arith.constant 0 : index
        %c0_15 = arith.constant 0 : index
        %34 = vector.load %arg12[%c0_14, %c0_15] : memref<64x128xf32, #tpu.memory_space<vmem>>, vector<64x128xf32>
        tpu.vector_store %arg12[%c0_14, %c0_15], %33 {strides = array<i32>} : memref<64x128xf32, #tpu.memory_space<vmem>>, vector<64x128xf32>,
      } else {
      }
      %c0 = arith.constant 0 : index
      %c0_4 = arith.constant 0 : index
      %c0_5 = arith.constant 0 : index
      %9 = vector.load %arg3[%c0, %c0_4, %c0_5] : memref<1x64x1024xf32, #tpu.memory_space<vmem>>, vector<1x64x1024xf32>
      %10 = vector.shape_cast %9 : vector<1x64x1024xf32> to vector<64x1024xf32>
      %c0_6 = arith.constant 0 : index
      %c0_7 = arith.constant 0 : index
      %11 = vector.load %arg11[%c0_6, %c0_7] : memref<64x1024xf32, #tpu.memory_space<vmem>>, vector<64x1024xf32>
      tpu.vector_store %arg11[%c0_6, %c0_7], %10 {strides = array<i32>} : memref<64x1024xf32, #tpu.memory_space<vmem>>, vector<64x1024xf32>,
      %12 = vector.extract_strided_slice %10 {offsets = [0, 0], sizes = [64, 128], strides = [1, 1]} : vector<64x1024xf32> to vector<64x128xf32>
      %13 = vector.extract_strided_slice %10 {offsets = [0, 128], sizes = [64, 128], strides = [1, 1]} : vector<64x1024xf32> to vector<64x128xf32>
      %14 = arith.addf %12, %13 : vector<64x128xf32>
      %15 = vector.extract_strided_slice %10 {offsets = [0, 256], sizes = [64, 128], strides = [1, 1]} : vector<64x1024xf32> to vector<64x128xf32>
      %16 = arith.addf %14, %15 : vector<64x128xf32>
      %17 = vector.extract_strided_slice %10 {offsets = [0, 384], sizes = [64, 128], strides = [1, 1]} : vector<64x1024xf32> to vector<64x128xf32>
      %18 = arith.addf %16, %17 : vector<64x128xf32>
      %19 = vector.extract_strided_slice %10 {offsets = [0, 512], sizes = [64, 128], strides = [1, 1]} : vector<64x1024xf32> to vector<64x128xf32>
      %20 = arith.addf %18, %19 : vector<64x128xf32>
      %21 = vector.extract_strided_slice %10 {offsets = [0, 640], sizes = [64, 128], strides = [1, 1]} : vector<64x1024xf32> to vector<64x128xf32>
      %22 = arith.addf %20, %21 : vector<64x128xf32>
      %23 = vector.extract_strided_slice %10 {offsets = [0, 768], sizes = [64, 128], strides = [1, 1]} : vector<64x1024xf32> to vector<64x128xf32>
      %24 = arith.addf %22, %23 : vector<64x128xf32>
      %25 = vector.extract_strided_slice %10 {offsets = [0, 896], sizes = [64, 128], strides = [1, 1]} : vector<64x1024xf32> to vector<64x128xf32>
      %26 = arith.addf %24, %25 : vector<64x128xf32>
      %c0_8 = arith.constant 0 : index
      %c0_9 = arith.constant 0 : index
      %27 = vector.load %arg12[%c0_8, %c0_9] : memref<64x128xf32, #tpu.memory_space<vmem>>, vector<64x128xf32>
      %28 = arith.addf %27, %26 : vector<64x128xf32>
      %c0_10 = arith.constant 0 : index
      %c0_11 = arith.constant 0 : index
      %29 = vector.load %arg12[%c0_10, %c0_11] : memref<64x128xf32, #tpu.memory_space<vmem>>, vector<64x128xf32>
      tpu.vector_store %arg12[%c0_10, %c0_11], %28 {strides = array<i32>} : memref<64x128xf32, #tpu.memory_space<vmem>>, vector<64x128xf32>,
      %c0_i32_12 = arith.constant 0 : i32
      %30 = arith.cmpi eq, %arg2, %c0_i32_12 : i32
      %31 = arith.extui %30 : i1 to i32
      %c0_i32_13 = arith.constant 0 : i32
      %32 = arith.cmpi ne, %31, %c0_i32_13 : i32
      scf.if %32 {
        %c0_14 = arith.constant 0 : index
        %c0_15 = arith.constant 0 : index
        %33 = vector.load %arg12[%c0_14, %c0_15] : memref<64x128xf32, #tpu.memory_space<vmem>>, vector<64x128xf32>
        %cst = arith.constant dense<0.000000e+00> : vector<64xf32>
        %34 = vector.multi_reduction <add>, %33, %cst [1] : vector<64x128xf32> to vector<64xf32>
        %35 = vector.shape_cast %34 : vector<64xf32> to vector<64x1xf32>
        %cst_16 = arith.constant 9.765625E-4 : f32
        %36 = vector.broadcast %cst_16 : f32 to vector<64x1xf32>
        %37 = arith.mulf %35, %36 : vector<64x1xf32>
        %c0_17 = arith.constant 0 : index
        %c0_18 = arith.constant 0 : index
        %38 = vector.load %arg4[%c0_17, %c0_18] : memref<4x64xf32, #tpu.memory_space<vmem>>, vector<4x64xf32>
        %cst_19 = arith.constant dense<0.000000e+00> : vector<4x1xf32>
        %39 = tpu.matmul %38, %37, %cst_19 {dimension_numbers = #tpu.dot_dimension_numbers<[1], [0], [0], [1], [0, 0, 1, 1], [], []>} : vector<4x64xf32>, vector<64x1xf32>, vector<4x1xf32> -> vector<4x1xf32>
        %c0_20 = arith.constant 0 : index
        %c0_21 = arith.constant 0 : index
        %40 = vector.load %arg5[%c0_20, %c0_21] : memref<4x1xf32, #tpu.memory_space<vmem>>, vector<4x1xf32>
        %41 = arith.addf %39, %40 : vector<4x1xf32>
        %c0_22 = arith.constant 0 : index
        %c0_23 = arith.constant 0 : index
        %42 = vector.load %arg6[%c0_22, %c0_23] : memref<64x4xf32, #tpu.memory_space<vmem>>, vector<64x4xf32>
        %cst_24 = arith.constant dense<0.000000e+00> : vector<64x1xf32>
        %43 = tpu.matmul %42, %41, %cst_24 {dimension_numbers = #tpu.dot_dimension_numbers<[1], [0], [0], [1], [0, 0, 1, 1], [], []>} : vector<64x4xf32>, vector<4x1xf32>, vector<64x1xf32> -> vector<64x1xf32>
        %c0_25 = arith.constant 0 : index
        %c0_26 = arith.constant 0 : index
        %44 = vector.load %arg7[%c0_25, %c0_26] : memref<64x1xf32, #tpu.memory_space<vmem>>, vector<64x1xf32>
        %45 = arith.addf %43, %44 : vector<64x1xf32>
        %c0_27 = arith.constant 0 : index
        %c0_28 = arith.constant 0 : index
        %46 = vector.load %arg13[%c0_27, %c0_28] : memref<64x1xf32, #tpu.memory_space<vmem>>, vector<64x1xf32>
        tpu.vector_store %arg13[%c0_27, %c0_28], %45 {strides = array<i32>} : memref<64x1xf32, #tpu.memory_space<vmem>>, vector<64x1xf32>,
        %c0_29 = arith.constant 0 : index
        %c0_30 = arith.constant 0 : index
        %47 = vector.load %arg8[%c0_29, %c0_30] : memref<1x4xf32, #tpu.memory_space<vmem>>, vector<1x4xf32>
        %cst_31 = arith.constant dense<0.000000e+00> : vector<1x1xf32>
        %48 = tpu.matmul %47, %41, %cst_31 {dimension_numbers = #tpu.dot_dimension_numbers<[1], [0], [0], [1], [0, 0, 1, 1], [], []>} : vector<1x4xf32>, vector<4x1xf32>, vector<1x1xf32> -> vector<1x1xf32>
        %c0_32 = arith.constant 0 : index
        %c0_33 = arith.constant 0 : index
        %49 = vector.load %arg9[%c0_32, %c0_33] : memref<1x1xf32, #tpu.memory_space<vmem>>, vector<1x1xf32>
        %50 = arith.addf %48, %49 : vector<1x1xf32>
        %51 = vector.shape_cast %50 : vector<1x1xf32> to vector<1x1xf32>
        %52 = vector.broadcast %51 : vector<1x1xf32> to vector<64x1xf32>
        %c0_34 = arith.constant 0 : index
        %c0_35 = arith.constant 0 : index
        %53 = vector.load %arg14[%c0_34, %c0_35] : memref<64x1xf32, #tpu.memory_space<vmem>>, vector<64x1xf32>
        tpu.vector_store %arg14[%c0_34, %c0_35], %52 {strides = array<i32>} : memref<64x1xf32, #tpu.memory_space<vmem>>, vector<64x1xf32>,
      } else {
      }
    } else {
    }
    %c1_i32 = arith.constant 1 : i32
    %3 = arith.cmpi eq, %arg1, %c1_i32 : i32
    %4 = arith.extui %3 : i1 to i32
    %c0_i32_1 = arith.constant 0 : i32
    %5 = arith.cmpi ne, %4, %c0_i32_1 : i32
    scf.if %5 {
      %c0 = arith.constant 0 : index
      %c0_2 = arith.constant 0 : index
      %6 = vector.load %arg11[%c0, %c0_2] : memref<64x1024xf32, #tpu.memory_space<vmem>>, vector<64x1024xf32>
      %c0_3 = arith.constant 0 : index
      %c0_4 = arith.constant 0 : index
      %7 = vector.load %arg13[%c0_3, %c0_4] : memref<64x1xf32, #tpu.memory_space<vmem>>, vector<64x1xf32>
      %8 = vector.broadcast %7 : vector<64x1xf32> to vector<64x1024xf32>
      %9 = arith.mulf %6, %8 : vector<64x1024xf32>
      %c0_5 = arith.constant 0 : index
      %c0_6 = arith.constant 0 : index
      %10 = vector.load %arg14[%c0_5, %c0_6] : memref<64x1xf32, #tpu.memory_space<vmem>>, vector<64x1xf32>
      %11 = vector.broadcast %10 : vector<64x1xf32> to vector<64x1024xf32>
      %12 = arith.addf %9, %11 : vector<64x1024xf32>
      %13 = vector.shape_cast %12 : vector<64x1024xf32> to vector<1x64x1024xf32>
      %c0_7 = arith.constant 0 : index
      %c0_8 = arith.constant 0 : index
      %c0_9 = arith.constant 0 : index
      %14 = vector.load %arg10[%c0_7, %c0_8, %c0_9] : memref<1x64x1024xf32, #tpu.memory_space<vmem>>, vector<1x64x1024xf32>
      tpu.vector_store %arg10[%c0_7, %c0_8, %c0_9], %13 {strides = array<i32>} : memref<1x64x1024xf32, #tpu.memory_space<vmem>>, vector<1x64x1024xf32>,
    } else {
    }
    return
  }
  func.func @transform_0(%arg0: i32, %arg1: i32, %arg2: i32) -> (i32, i32, i32) {
    %c1_i32 = arith.constant 1 : i32
    %0 = arith.subi %c1_i32, %arg1 : i32
    %1 = arith.muli %arg2, %0 : i32
    %c0_i32 = arith.constant 0 : i32
    %2 = arith.muli %c0_i32, %arg1 : i32
    %3 = arith.addi %1, %2 : i32
    %c0_i32_0 = arith.constant 0 : i32
    %c0_i32_1 = arith.constant 0 : i32
    return %arg0, %c0_i32_0, %3 : i32, i32, i32
  }
  func.func @transform_1(%arg0: i32, %arg1: i32, %arg2: i32) -> (i32, i32) {
    %c0_i32 = arith.constant 0 : i32
    %c0_i32_0 = arith.constant 0 : i32
    %c0_i32_1 = arith.constant 0 : i32
    return %c0_i32, %c0_i32_0 : i32, i32
  }
  func.func @transform_2(%arg0: i32, %arg1: i32, %arg2: i32) -> (i32, i32) {
    %c0_i32 = arith.constant 0 : i32
    %c0_i32_0 = arith.constant 0 : i32
    %c0_i32_1 = arith.constant 0 : i32
    return %c0_i32, %c0_i32_0 : i32, i32
  }
  func.func @transform_3(%arg0: i32, %arg1: i32, %arg2: i32) -> (i32, i32) {
    %c0_i32 = arith.constant 0 : i32
    %c0_i32_0 = arith.constant 0 : i32
    %c0_i32_1 = arith.constant 0 : i32
    return %c0_i32, %c0_i32_0 : i32, i32
  }
  func.func @transform_4(%arg0: i32, %arg1: i32, %arg2: i32) -> (i32, i32) {
    %c0_i32 = arith.constant 0 : i32
    %c0_i32_0 = arith.constant 0 : i32
    %c0_i32_1 = arith.constant 0 : i32
    return %c0_i32, %c0_i32_0 : i32, i32
  }
  func.func @transform_5(%arg0: i32, %arg1: i32, %arg2: i32) -> (i32, i32) {
    %c0_i32 = arith.constant 0 : i32
    %c0_i32_0 = arith.constant 0 : i32
    %c0_i32_1 = arith.constant 0 : i32
    return %c0_i32, %c0_i32_0 : i32, i32
  }
  func.func @transform_6(%arg0: i32, %arg1: i32, %arg2: i32) -> (i32, i32) {
    %c0_i32 = arith.constant 0 : i32
    %c0_i32_0 = arith.constant 0 : i32
    %c0_i32_1 = arith.constant 0 : i32
    return %c0_i32, %c0_i32_0 : i32, i32
  }
  func.func @transform_7(%arg0: i32, %arg1: i32, %arg2: i32) -> (i32, i32, i32) {
    %0 = arith.muli %arg2, %arg1 : i32
    %c0_i32 = arith.constant 0 : i32
    %c0_i32_0 = arith.constant 0 : i32
    return %arg0, %c0_i32, %0 : i32, i32, i32
  }
}

</mosaic_0001>

<bundles_post_ra>
// kernel: tpu_custom_call.1
= control target key start
LH: loop header
LB: loop body
LE: loop exit
PB: predicated region body
PF: predicated region fallthrough
CT: control target
= control target key end

     0   :  { %s2416_s0 = inlined_call_operand.hbm [shape: f32[2,64,1024], index: 0, kind: input, shape index: {}]   ;;  %s2417_s1 = inlined_call_operand.vmem [shape: f32[4,64], index: 1, kind: input, shape index: {}]   ;;  %s2418_s2 = inlined_call_operand.vmem [shape: f32[4,1], index: 2, kind: input, shape index: {}]   ;;  %s2419_s3 = inlined_call_operand.vmem [shape: f32[64,4], index: 3, kind: input, shape index: {}]   ;;  %s2420_s4 = inlined_call_operand.vmem [shape: f32[64,1], index: 4, kind: input, shape index: {}]   ;;  %s2421_s5 = inlined_call_operand.vmem [shape: f32[1,4], index: 5, kind: input, shape index: {}]   ;;  %s2422_s6 = inlined_call_operand.<no memory space> [shape: f32[1,1], index: 6, kind: input, shape index: {}]   ;;  %s2423_s7 = inlined_call_operand.hbm [shape: f32[2,64,1024], index: 7, kind: output, shape index: {}]  }
   0x1   :  { %v12_v0 = vstv %s2422_s6 }
   0x2   :  { %13 = vst [vmem:[#allocation6] sm:$0x1] %v12_v0 }
   0x3   :  { %14 = vsyncpa [#allocation8], 0 }
   0x4   :  { %16 = vsyncpa [#allocation8 + $0x1], 0 }
   0x5   :  { %17 = vsyncpa [#allocation9], 0 }
   0x6   :  { %19 = vsyncpa [#allocation9 + $0x1], 0  ;;  %s1756_s26 = smov 0   ;;  %s1758_s27 = smov 0  }
   0x7   :  { %s1760_s28 = smov 0   ;;  %s1762_s29 = smov 0  }
   0x8   :  { %s1764_s30 = smov 0   ;;  %s1766_s8 = smov 0  }
   0x9   :  { %s1768_s9 = smov 0   ;;  %s1770_s6 = smov 0  }
   0xa LB: > { %s1384_s10 = sadd.s32 4294967295, %s1701_s6   ;;  %s1385_s11 = sadd.s32 4294967294, %s1701_s6   ;;  %s1701_s6 = sphi %s1770_s6, %s25_s6   ;;  %s1697_s9 = sphi %s1768_s9, %s2464_s9   ;;  %s1693_s8 = sphi %s1766_s8, %s2463_s8   ;;  %s1689_s30 = sphi %s1764_s30, %s2462_s30   ;;  %s1685_s29 = sphi %s1762_s29, %s2461_s29   ;;  %s1681_s28 = sphi %s1760_s28, %s2460_s28   ;;  %s1677_s27 = sphi %s1758_s27, %s2459_s27   ;;  %s1673_s26 = sphi %s1756_s26, %s2458_s26  }
   0xb   : > { %s40_s12 = sadd.s32 1, %s1693_s8  ;;  %s44_s13 = sadd.s32 1, %s1697_s9 }
   0xc   : > { %p42_p0 = scmp.ge.s32.totalorder %s40_s12, 2  ;;  %s57_s14 = sadd.s32 1, %s1681_s28 }
   0xd   : > { %p64_p1 = scmp.ne.s32.totalorder %s1681_s28, %s1677_s27  ;;  %p65_p2 = scmp.eq.s32.totalorder %s1701_s6, 0 }
   0xe   : > { %s2466_s12 = smov (%p42_p0, %s40_s12), 0  ;;  %s2468_s13 = smov (!%p42_p0, %s44_s13), %s1697_s9 }
   0xf   : > { %p1807_p3 = por %p65_p2, %p64_p1  ;;  %p70_p4 = scmp.ne.s32.totalorder %s1677_s27, %s1673_s26 }
  0x10   : > { %p46_p5 = scmp.ge.s32.totalorder %s2468_s13, 2  ;;  %p71_p6 = scmp.eq.s32.totalorder %s1384_s10, 0 }
  0x11   : > { %p224_p7 = scmp.eq.s32.totalorder %s1384_s10, 3  ;;  %p230_p8 = scmp.eq.s32.totalorder %s1385_s11, 3 }
  0x12   : > { %s2470_s13 = smov (%p46_p5, %s2468_s13), 0  ;;  %p1815_p9 = por %p71_p6, %p70_p4 }
  0x13   : > { %2427 = sst [smem:[#allocation13_spill]] %s2470_s13  ;;  %p1819_p10 = por %p224_p7, %p64_p1 }
  0x14   : > { %s52_s18 = ssub.s32 %s1697_s9, %s2470_s13  ;;  %p1825_p11 = por %p230_p8, %p70_p4 }
  0x15   : > { %s2429_s17 = scalar_select %p1819_p10, 1, 0 }
  0x16   : > { %s2430_s19 = scalar_select %p1825_p11, 1, 0 }
  0x17   : > { %p55_p12 = scmp.eq.s32.totalorder %s52_s18, 0  ;;  %p1497_p13 = scmp.lt.s32.totalorder %s1701_s6, 4 }
  0x18   : > { %s268_s20 = sand.u32 1, %s1681_s28   ;;  %s1413_s23 = sshll.u32 %s1697_s9, 13 }
  0x19   : > { %s1832_s21 = scalar_select %p55_p12, %s1681_s28, %s57_s14  }
  0x1a   : > { %s1388_s22 = sshll.u32 %s268_s20, 9  ;;  %s1838_s10 = scalar_lea.hbm %s2416_s0, %s1413_s23 }
  0x1b   : > { %s272_s11 = scalar_lea.vmem [#allocation7], %s1388_s22  ;;  %p1844_p0 = pnand %p1497_p13, %p1807_p3 }
  0x1c   : > { %s283_s13 = sshll.u32 %s272_s11, 4  ;;  %s1849_s14 = scalar_lea.sflag [#allocation8], %s268_s20  ;;  %s1840_s13 = int_to_ptr.vmem [resolvable:$true] %s283_s13 }
  0x1d   : > { %s1573_s23 = scalar_lea.hbm %s1838_s10, 8192  ;;  %p1575_p4 = pneg %p1844_p0 }
  0x1e   : > { %p1574_p2 = scmp.ne.s32.totalorder %s1838_s10, %s1573_s23  ;;  %s1578_s15 = scalar_lea.hbm %s2416_s0, 16384 }
  0x1f   : > { %p1579_p3 = scmp.lt.u32.totalorder %s1838_s10, %s2416_s0  ;;  %p1580_p7 = scmp.lt.u32.totalorder %s1578_s15, %s1573_s23 }
  0x20   : > { %p1576_p5 = pnand %p1575_p4, %p1574_p2  ;;  %p1582_p12 = scmp.lt.u32.totalorder %s1573_s23, %s1838_s10 }
  0x21   : > { %p1581_p8 = por %p1580_p7, %p1579_p3 }
  0x22   : > { %p1577_p6 = pneg %p1576_p5 }
  0x23   : > { %p1583_p13 = por %p1582_p12, %p1581_p8 }
  0x25   : > { %p1584_p1 = pnand %p1583_p13, %p1577_p6 }
  0x27   : > { %1587 = shalt.err (!%p1584_p1)
}
  0x28   : > { %s1588_s20 = scalar_lea.vmem %s1840_s13, 8192  ;;  %s1703_s22 = smov [#allocation7]  }
  0x29   : > { %p1589_p2 = scmp.ne.s32.totalorder %s1840_s13, %s1588_s20  ;;  %s1593_s24 = sshll.u32 %s1703_s22, 4  ;;  %s1594_s24 = int_to_ptr.vmem [resolvable:$false] %s1593_s24 }
  0x2a   : > { %s1595_s25 = scalar_lea.vmem %s1594_s24, 16384  ;;  %p1596_p10 = scmp.lt.s32.totalorder %s1840_s13, %s1594_s24 }
  0x2b   : > { %p1591_p5 = pnand %p1589_p2, %p1575_p4  ;;  %p1597_p3 = scmp.lt.s32.totalorder %s1595_s25, %s1588_s20 }
  0x2d   : > { %p1592_p11 = pneg %p1591_p5  ;;  %p1598_p7 = por %p1597_p3, %p1596_p10 }
  0x2f   : > { %p1599_p8 = pnand %p1598_p7, %p1592_p11 }
  0x31   : > { %1602 = shalt.err (!%p1599_p8)
}
  0x32   : > { %s1704_s23 = smov 1024   ;;  %s1705_s15 = smov 64  }
  0x33   : > { %1492 = dma.hbm_to_vmem [thread:$0]  (!%p1844_p0), %s1838_s10, 8192, %s1840_s13, %s1849_s14, %s1704_s23, %s1704_s23, %s1705_s15  }
  0x34   : > { %p291_p1 = scmp.lt.s32.totalorder %s1701_s6, 5  ;;  %p2432_p4 = scmp.ge.s32.totalorder %s1701_s6, 1 }
  0x36   : > { %p292_p6 = pnand %p2432_p4, %p291_p1 }
  0x37   : > { %s1881_s11 = sand.u32 (!%p292_p6), 1, %s1677_s27  }
  0x38   : > { %295 = sbr.rel (%p292_p6) target bundleno = 924 (0x39c), region = 48  ;;  %s1392_s20 = sshll.u32 (!%p292_p6), %s1881_s11, 9 }
  0x39   : > { %s298_s22 = scalar_lea.sflag (!%p292_p6), [#allocation8], %s1881_s11  ;;  %s1885_s24 = scalar_lea.vmem (!%p292_p6), [#allocation7], %s1392_s20 }
  0x3f   : > { %1664 = dma.done.wait (%p1815_p9), %s298_s22, 8192  }
  0x40   : > { %1666 = vsyncadd (%p1815_p9), %s298_s22, 4294959104  ;;  %s1891_s13 = scalar_lea.vmem [#allocation10], %s1392_s20  ;;  %p1394_p10 = scmp.ne.s32.totalorder %s1685_s29, 0 }
  0x41   : > { %v369_v1 = vld [vmem:[%s1885_s24 + $0x80] sm:$0xff] (!%p1394_p10)  ;;  %v370_v2 = vld [vmem:[%s1885_s24 + $0x88] sm:$0xff] (!%p1394_p10)  ;;  %v371_v3 = vld [vmem:[%s1885_s24 + $0x90] sm:$0xff] (!%p1394_p10)  ;;  %vm1707_vm0 = vmmov (!%p1394_p10), 0   ;;  %vm598_vm1 = vcmask (!%p1394_p10), 523264   ;;  %vm688_vm2 = vcmask (!%p1394_p10), 31744  }
  0x42   : > { %340 = sbr.rel (%p1394_p10) target bundleno = 708 (0x2c4), region = 56  ;;  %v372_v4 = vld [vmem:[%s1885_s24 + $0x98] sm:$0xff] (!%p1394_p10)  ;;  %v373_v5 = vld [vmem:[%s1885_s24 + $0xa0] sm:$0xff] (!%p1394_p10)  ;;  %v374_v6 = vld [vmem:[%s1885_s24 + $0xa8] sm:$0xff] (!%p1394_p10)  ;;  %434 = vst [vmem:[#allocation2 + $0x88] sm:$0xff] (!%p1394_p10), %v370_v2  ;;  %v483_v7 = vadd.f32 (!%p1394_p10), %v370_v2, %v369_v1  ;;  %vm713_vm3 = vcmask (!%p1394_p10), 1043456  }
  0x43   : > { %435 = vst [vmem:[#allocation2 + $0x90] sm:$0xff] (!%p1394_p10), %v371_v3  ;;  %433 = vst [vmem:[#allocation2 + $0x80] sm:$0xff] (!%p1394_p10), %v369_v1  ;;  %v1901_v8 = vld [vmem:[%s1885_s24 + $0xb0] sm:$0xff] (!%p1394_p10)  ;;  %v1904_v9 = vld [vmem:[%s1885_s24 + $0xb8] sm:$0xff] (!%p1394_p10)  ;;  %vm822_vm4 = vcmask (!%p1394_p10), 7168  }
  0x44   : > { %436 = vst [vmem:[#allocation2 + $0x98] sm:$0xff] (!%p1394_p10), %v372_v4  ;;  %437 = vst [vmem:[#allocation2 + $0xa0] sm:$0xff] (!%p1394_p10), %v373_v5  ;;  %v353_v10 = vld [vmem:[%s1885_s24] sm:$0xff] (!%p1394_p10)  ;;  %v491_v11 = vadd.f32 (!%p1394_p10), %v483_v7, %v371_v3  ;;  %v354_v12 = vld [vmem:[%s1885_s24 + $0x8] sm:$0xff] (!%p1394_p10) }
  0x45   : > { %438 = vst [vmem:[#allocation2 + $0xa8] sm:$0xff] (!%p1394_p10), %v374_v6  ;;  %439 = vst [vmem:[#allocation2 + $0xb0] sm:$0xff] (!%p1394_p10), %v1901_v8  ;;  %v355_v13 = vld [vmem:[%s1885_s24 + $0x10] sm:$0xff] (!%p1394_p10)  ;;  %v356_v14 = vld [vmem:[%s1885_s24 + $0x18] sm:$0xff] (!%p1394_p10)  ;;  %v481_v18 = vadd.f32 (!%p1394_p10), %v354_v12, %v353_v10 }
  0x46   : > { %440 = vst [vmem:[#allocation2 + $0xb8] sm:$0xff] (!%p1394_p10), %v1904_v9  ;;  %417 = vst [vmem:[#allocation2] sm:$0xff] (!%p1394_p10), %v353_v10  ;;  %v357_v15 = vld [vmem:[%s1885_s24 + $0x20] sm:$0xff] (!%p1394_p10)  ;;  %v358_v16 = vld [vmem:[%s1885_s24 + $0x28] sm:$0xff] (!%p1394_p10)  ;;  %v499_v19 = vadd.f32 (!%p1394_p10), %v491_v11, %v372_v4 }
  0x47   : > { %v1915_v17 = vld [vmem:[%s1885_s24 + $0x30] sm:$0xff] (!%p1394_p10)  ;;  %418 = vst [vmem:[#allocation2 + $0x8] sm:$0xff] (!%p1394_p10), %v354_v12  ;;  %419 = vst [vmem:[#allocation2 + $0x10] sm:$0xff] (!%p1394_p10), %v355_v13  ;;  %v1918_v20 = vld [vmem:[%s1885_s24 + $0x38] sm:$0xff] (!%p1394_p10)  ;;  %v489_v23 = vadd.f32 (!%p1394_p10), %v481_v18, %v355_v13 }
  0x48   : > { %420 = vst [vmem:[#allocation2 + $0x18] sm:$0xff] (!%p1394_p10), %v356_v14  ;;  %421 = vst [vmem:[#allocation2 + $0x20] sm:$0xff] (!%p1394_p10), %v357_v15  ;;  %v377_v21 = vld [vmem:[%s1885_s24 + $0xc0] sm:$0xff] (!%p1394_p10)  ;;  %v378_v22 = vld [vmem:[%s1885_s24 + $0xc8] sm:$0xff] (!%p1394_p10)  ;;  %v507_v28 = vadd.f32 (!%p1394_p10), %v499_v19, %v373_v5 }
  0x49   : > { %422 = vst [vmem:[#allocation2 + $0x28] sm:$0xff] %v358_v16  ;;  %423 = vst [vmem:[#allocation2 + $0x30] sm:$0xff] %v1915_v17  ;;  %v379_v24 = vld [vmem:[%s1885_s24 + $0xd0] sm:$0xff]  ;;  %v380_v25 = vld [vmem:[%s1885_s24 + $0xd8] sm:$0xff]  ;;  %v484_v27 = vadd.f32 %v378_v22, %v377_v21  ;;  %v497_v32 = vadd.f32 %v489_v23, %v356_v14 }
  0x4a   : > { %424 = vst [vmem:[#allocation2 + $0x38] sm:$0xff] %v1918_v20  ;;  %v381_v26 = vld [vmem:[%s1885_s24 + $0xe0] sm:$0xff]  ;;  %441 = vst [vmem:[#allocation2 + $0xc0] sm:$0xff] %v377_v21  ;;  %v382_v29 = vld [vmem:[%s1885_s24 + $0xe8] sm:$0xff]  ;;  %v515_v37 = vadd.f32 %v507_v28, %v374_v6 }
  0x4b   : > { %442 = vst [vmem:[#allocation2 + $0xc8] sm:$0xff] %v378_v22  ;;  %v1929_v30 = vld [vmem:[%s1885_s24 + $0xf0] sm:$0xff]  ;;  %v1932_v31 = vld [vmem:[%s1885_s24 + $0xf8] sm:$0xff]  ;;  %443 = vst [vmem:[#allocation2 + $0xd0] sm:$0xff] %v379_v24  ;;  %v492_v33 = vadd.f32 %v484_v27, %v379_v24  ;;  %v505_v42 = vadd.f32 %v497_v32, %v357_v15 }
  0x4c   : > { %444 = vst [vmem:[#allocation2 + $0xd8] sm:$0xff] %v380_v25  ;;  %445 = vst [vmem:[#allocation2 + $0xe0] sm:$0xff] %v381_v26  ;;  %v361_v34 = vld [vmem:[%s1885_s24 + $0x40] sm:$0xff]  ;;  %v362_v35 = vld [vmem:[%s1885_s24 + $0x48] sm:$0xff]  ;;  %v523_v47 = vadd.f32 %v515_v37, %v1901_v8 }
  0x4d   : > { %446 = vst [vmem:[#allocation2 + $0xe8] sm:$0xff] %v382_v29  ;;  %447 = vst [vmem:[#allocation2 + $0xf0] sm:$0xff] %v1929_v30  ;;  %v363_v36 = vld [vmem:[%s1885_s24 + $0x50] sm:$0xff]  ;;  %v364_v38 = vld [vmem:[%s1885_s24 + $0x58] sm:$0xff]  ;;  %v482_v41 = vadd.f32 %v362_v35, %v361_v34  ;;  %v500_v43 = vadd.f32 %v492_v33, %v380_v25  ;;  %v513_v52 = vadd.f32 %v505_v42, %v358_v16 }
  0x4e   : > { %448 = vst [vmem:[#allocation2 + $0xf8] sm:$0xff] %v1932_v31  ;;  %v365_v39 = vld [vmem:[%s1885_s24 + $0x60] sm:$0xff]  ;;  %v1942_v40 = vld [vmem:[%s1885_s24 + $0x68] sm:$0xff]  ;;  %425 = vst [vmem:[#allocation2 + $0x40] sm:$0xff] %v361_v34  ;;  %v531_v58 = vadd.f32 %v523_v47, %v1904_v9 }
  0x4f   : > { %426 = vst [vmem:[#allocation2 + $0x48] sm:$0xff] %v362_v35  ;;  %427 = vst [vmem:[#allocation2 + $0x50] sm:$0xff] %v363_v36  ;;  %v1945_v44 = vld [vmem:[%s1885_s24 + $0x70] sm:$0xff]  ;;  %v1948_v45 = vld [vmem:[%s1885_s24 + $0x78] sm:$0xff]  ;;  %v490_v48 = vadd.f32 %v482_v41, %v363_v36  ;;  %v508_v53 = vadd.f32 %v500_v43, %v381_v26  ;;  %v521_v63 = vadd.f32 %v513_v52, %v1915_v17 }
  0x50   : > { %428 = vst [vmem:[#allocation2 + $0x58] sm:$0xff] %v364_v38  ;;  %429 = vst [vmem:[#allocation2 + $0x60] sm:$0xff] %v365_v39  ;;  %v393_v46 = vld [vmem:[%s1885_s24 + $0x140] sm:$0xff]  ;;  %v394_v49 = vld [vmem:[%s1885_s24 + $0x148] sm:$0xff]  ;;  %576 = vadd.xlane.f32.xlu1 %v531_v58  ;;  %v1708_v58 = vmov 0.0  }
  0x51   : > { %430 = vst [vmem:[#allocation2 + $0x68] sm:$0xff] %v1942_v40  ;;  %431 = vst [vmem:[#allocation2 + $0x70] sm:$0xff] %v1945_v44  ;;  %v395_v50 = vld [vmem:[%s1885_s24 + $0x150] sm:$0xff]  ;;  %v396_v51 = vld [vmem:[%s1885_s24 + $0x158] sm:$0xff]  ;;  %v486_v57 = vadd.f32 %v394_v49, %v393_v46  ;;  %v498_v59 = vadd.f32 %v490_v48, %v364_v38  ;;  %v516_v0 = vadd.f32 %v508_v53, %v382_v29  ;;  %1451 = vmatprep.mubr.msk.f32.mxu0 %vm1707_vm0, %v1708_v58 }
  0x52   : > { %432 = vst [vmem:[#allocation2 + $0x78] sm:$0xff] %v1948_v45  ;;  %457 = vst [vmem:[#allocation2 + $0x140] sm:$0xff] %v393_v46  ;;  %v397_v54 = vld [vmem:[%s1885_s24 + $0x160] sm:$0xff]  ;;  %v1960_v55 = vld [vmem:[%s1885_s24 + $0x168] sm:$0xff]  ;;  %v529_v10 = vadd.f32 %v521_v63, %v1918_v20 }
  0x53   : > { %v1963_v56 = vld [vmem:[%s1885_s24 + $0x170] sm:$0xff]  ;;  %458 = vst [vmem:[#allocation2 + $0x148] sm:$0xff] %v394_v49  ;;  %459 = vst [vmem:[#allocation2 + $0x150] sm:$0xff] %v395_v50  ;;  %v1967_v60 = vld [vmem:[%s1885_s24 + $0x178] sm:$0xff]  ;;  %v494_v1 = vadd.f32 %v486_v57, %v395_v50  ;;  %v506_v6 = vadd.f32 %v498_v59, %v365_v39  ;;  %v524_v11 = vadd.f32 %v516_v0, %v1929_v30  ;;  %v1706_v57 = vmov 0.0|0.0  }
  0x54   : > { %460 = vst [vmem:[#allocation2 + $0x158] sm:$0xff] %v396_v51  ;;  %461 = vst [vmem:[#allocation2 + $0x160] sm:$0xff] %v397_v54  ;;  %v385_v61 = vld [vmem:[%s1885_s24 + $0x100] sm:$0xff]  ;;  %v386_v62 = vld [vmem:[%s1885_s24 + $0x108] sm:$0xff]  ;;  %572 = vadd.xlane.f32.xlu0 %v529_v10  ;;  %1473 = vmatprep.subr.bf16.mxu0 %v1706_v57 }
  0x55   : > { %462 = vst [vmem:[#allocation2 + $0x168] sm:$0xff] %v1960_v55  ;;  %463 = vst [vmem:[#allocation2 + $0x170] sm:$0xff] %v1963_v56  ;;  %v387_v2 = vld [vmem:[%s1885_s24 + $0x110] sm:$0xff]  ;;  %v388_v3 = vld [vmem:[%s1885_s24 + $0x118] sm:$0xff]  ;;  %v485_v5 = vadd.f32 %v386_v62, %v385_v61  ;;  %v502_v12 = vadd.f32 %v494_v1, %v396_v51  ;;  %v514_v17 = vadd.f32 %v506_v6, %v1942_v40 }
  0x56   : > { %464 = vst [vmem:[#allocation2 + $0x178] sm:$0xff] %v1967_v60  ;;  %v389_v4 = vld [vmem:[%s1885_s24 + $0x120] sm:$0xff]  ;;  %449 = vst [vmem:[#allocation2 + $0x100] sm:$0xff] %v385_v61  ;;  %v390_v7 = vld [vmem:[%s1885_s24 + $0x128] sm:$0xff]  ;;  %v532_v22 = vadd.f32 %v524_v11, %v1932_v31 }
  0x57   : > { %450 = vst [vmem:[#allocation2 + $0x108] sm:$0xff] %v386_v62  ;;  %v1980_v8 = vld [vmem:[%s1885_s24 + $0x130] sm:$0xff]  ;;  %v1983_v9 = vld [vmem:[%s1885_s24 + $0x138] sm:$0xff]  ;;  %451 = vst [vmem:[#allocation2 + $0x110] sm:$0xff] %v387_v2  ;;  %v493_v13 = vadd.f32 %v485_v5, %v387_v2  ;;  %v510_v23 = vadd.f32 %v502_v12, %v397_v54  ;;  %v522_v28 = vadd.f32 %v514_v17, %v1945_v44 }
  0x58   : > { %452 = vst [vmem:[#allocation2 + $0x118] sm:$0xff] %v388_v3  ;;  %453 = vst [vmem:[#allocation2 + $0x120] sm:$0xff] %v389_v4  ;;  %v409_v14 = vld [vmem:[%s1885_s24 + $0x1c0] sm:$0xff]  ;;  %v410_v15 = vld [vmem:[%s1885_s24 + $0x1c8] sm:$0xff]  ;;  %578 = vadd.xlane.f32.xlu1 %v532_v22 }
  0x59   : > { %454 = vst [vmem:[#allocation2 + $0x128] sm:$0xff] %v390_v7  ;;  %455 = vst [vmem:[#allocation2 + $0x130] sm:$0xff] %v1980_v8  ;;  %v411_v16 = vld [vmem:[%s1885_s24 + $0x1d0] sm:$0xff]  ;;  %v412_v18 = vld [vmem:[%s1885_s24 + $0x1d8] sm:$0xff]  ;;  %v488_v21 = vadd.f32 %v410_v15, %v409_v14  ;;  %v501_v24 = vadd.f32 %v493_v13, %v388_v3  ;;  %v518_v33 = vadd.f32 %v510_v23, %v1960_v55 }
  0x5a   : > { %456 = vst [vmem:[#allocation2 + $0x138] sm:$0xff] %v1983_v9  ;;  %v413_v19 = vld [vmem:[%s1885_s24 + $0x1e0] sm:$0xff]  ;;  %v414_v20 = vld [vmem:[%s1885_s24 + $0x1e8] sm:$0xff]  ;;  %473 = vst [vmem:[#allocation2 + $0x1c0] sm:$0xff] %v409_v14  ;;  %v530_v39 = vadd.f32 %v522_v28, %v1948_v45 }
  0x5b   : > { %474 = vst [vmem:[#allocation2 + $0x1c8] sm:$0xff] %v410_v15  ;;  %475 = vst [vmem:[#allocation2 + $0x1d0] sm:$0xff] %v411_v16  ;;  %v415_v25 = vld [vmem:[%s1885_s24 + $0x1f0] sm:$0xff]  ;;  %v416_v26 = vld [vmem:[%s1885_s24 + $0x1f8] sm:$0xff]  ;;  %v496_v29 = vadd.f32 %v488_v21, %v411_v16  ;;  %v509_v34 = vadd.f32 %v501_v24, %v389_v4  ;;  %v526_v42 = vadd.f32 %v518_v33, %v1963_v56 }
  0x5c   : > { %476 = vst [vmem:[#allocation2 + $0x1d8] sm:$0xff] %v412_v18  ;;  %477 = vst [vmem:[#allocation2 + $0x1e0] sm:$0xff] %v413_v19  ;;  %v401_v27 = vld [vmem:[%s1885_s24 + $0x180] sm:$0xff]  ;;  %v402_v30 = vld [vmem:[%s1885_s24 + $0x188] sm:$0xff]  ;;  %574 = vadd.xlane.f32.xlu0 %v530_v39 }
  0x5d   : > { %478 = vst [vmem:[#allocation2 + $0x1e8] sm:$0xff] %v414_v20  ;;  %479 = vst [vmem:[#allocation2 + $0x1f0] sm:$0xff] %v415_v25  ;;  %v403_v32 = vld [vmem:[%s1885_s24 + $0x190] sm:$0xff]  ;;  %v404_v31 = vld [vmem:[%s1885_s24 + $0x198] sm:$0xff]  ;;  %v487_v38 = vadd.f32 %v402_v30, %v401_v27  ;;  %v504_v40 = vadd.f32 %v496_v29, %v412_v18  ;;  %v517_v43 = vadd.f32 %v509_v34, %v390_v7 }
  0x5e   : > { %480 = vst [vmem:[#allocation2 + $0x1f8] sm:$0xff] %v416_v26  ;;  %465 = vst [vmem:[#allocation2 + $0x180] sm:$0xff] %v401_v27  ;;  %v405_v35 = vld [vmem:[%s1885_s24 + $0x1a0] sm:$0xff]  ;;  %v406_v36 = vld [vmem:[%s1885_s24 + $0x1a8] sm:$0xff]  ;;  %v534_v47 = vadd.f32 %v526_v42, %v1967_v60 }
  0x5f   : > { %v407_v37 = vld [vmem:[%s1885_s24 + $0x1b0] sm:$0xff]  ;;  %466 = vst [vmem:[#allocation2 + $0x188] sm:$0xff] %v402_v30  ;;  %467 = vst [vmem:[#allocation2 + $0x190] sm:$0xff] %v403_v32  ;;  %v408_v41 = vld [vmem:[%s1885_s24 + $0x1b8] sm:$0xff]  ;;  %v495_v44 = vadd.f32 %v487_v38, %v403_v32  ;;  %v512_v46 = vadd.f32 %v504_v40, %v413_v19  ;;  %v525_v48 = vadd.f32 %v517_v43, %v1980_v8  ;;  %v906_v43 = vlaneseq }
  0x60   : > { %468 = vst [vmem:[#allocation2 + $0x198] sm:$0xff] %v404_v31  ;;  %469 = vst [vmem:[#allocation2 + $0x1a0] sm:$0xff] %v405_v35  ;;  %582 = vadd.xlane.f32.xlu1 %v534_v47  ;;  %v596_v15 = vld [vmem:[%s2417_s1] sm:$0xf]  ;;  %v673_v21 = vld [vmem:[%s2419_s3 + $0x8] sm:$0xff] }
  0x61   : > { %470 = vst [vmem:[#allocation2 + $0x1a8] sm:$0xff] %v406_v36  ;;  %471 = vst [vmem:[#allocation2 + $0x1b0] sm:$0xff] %v407_v37  ;;  %v503_v49 = vadd.f32 %v495_v44, %v404_v31  ;;  %v520_v50 = vadd.f32 %v512_v46, %v414_v20  ;;  %v533_v45 = vadd.f32 %v525_v48, %v1983_v9  ;;  %v672_v16 = vld [vmem:[%s2419_s3] sm:$0xff]  ;;  %v674_v22 = vld [vmem:[%s2419_s3 + $0x10] sm:$0xff] }
  0x62   : > { %472 = vst [vmem:[#allocation2 + $0x1b8] sm:$0xff] %v408_v41  ;;  %1456 = vmatprep.mubr.msk.f32.mxu1 %vm688_vm2, %v672_v16  ;;  %v597_v17 = vld [vmem:[%s2418_s2] sm:$0xf]  ;;  %v675_v23 = vld [vmem:[%s2419_s3 + $0x18] sm:$0xff]  ;;  %v681_v29 = vld [vmem:[%s2420_s4 + $0x8] sm:$0xff] }
  0x63   : > { %v511_v51 = vadd.f32 %v503_v49, %v405_v35  ;;  %v528_v52 = vadd.f32 %v520_v50, %v415_v25  ;;  %580 = vadd.xlane.f32.xlu0 %v533_v45  ;;  %v676_v24 = vld [vmem:[%s2419_s3 + $0x20] sm:$0xff]  ;;  %v677_v25 = vld [vmem:[%s2419_s3 + $0x28] sm:$0xff]  ;;  %v679_v27 = vld [vmem:[%s2419_s3 + $0x38] sm:$0xff]  ;;  %v907_v45 = vshrl.u32 %v906_v43, 7 }
  0x64   : > { %v831_v28 = vld [vmem:[%s2421_s5] sm:$0x1]  ;;  %v683_v35 = vld [vmem:[%s2420_s4 + $0x18] sm:$0xff]  ;;  %v686_v50 = vld [vmem:[%s2420_s4 + $0x30] sm:$0xff] }
  0x65   : > { %v519_v53 = vadd.f32 %v511_v51, %v406_v36  ;;  %v536_v54 = vadd.f32 %v528_v52, %v416_v26  ;;  %v678_v26 = vld [vmem:[%s2419_s3 + $0x30] sm:$0xff]  ;;  %v680_v30 = vld [vmem:[%s2420_s4] sm:$0xff]  ;;  %v687_v49 = vld [vmem:[%s2420_s4 + $0x38] sm:$0xff] }
  0x66   : > { %v682_v36 = vld [vmem:[%s2420_s4 + $0x10] sm:$0xff]  ;;  %v684_v42 = vld [vmem:[%s2420_s4 + $0x20] sm:$0xff] }
  0x67   : > { %v527_v55 = vadd.f32 %v519_v53, %v407_v37  ;;  %586 = vadd.xlane.f32.xlu1 %v536_v54 }
  0x69   : > { %v535_v56 = vadd.f32 %v527_v55, %v408_v41  ;;  %v685_v41 = vld [vmem:[%s2420_s4 + $0x28] sm:$0xff]  ;;  %v832_v55 = vld [vmem:[#allocation6] sm:$0x1] }
  0x6b   : > { %584 = vadd.xlane.f32.xlu0 %v535_v56  ;;  %v908_v56 = vsub.s32 0, %v907_v45 }
  0xdd   : > { %v577_v59 = vpop.xlane.xlu1 %576 }
  0xde   : > { %v590_v1 = vmul.f32 0.0009765625, %v577_v59 }
  0xe1   : > { %v573_v60 = vpop.xlane.xlu0 %572 }
  0xe2   : > { %v588_v63 = vmul.f32 0.0009765625, %v573_v60 }
  0xe5   : > { %v579_v61 = vpop.xlane.xlu1 %578 }
  0xe6   : > { %v591_v2 = vmul.f32 0.0009765625, %v579_v61 }
  0xe8   : > { %v1477_v8 = vpack.c.bf16 %v591_v2, %v590_v1 }
  0xe9   : > { %v575_v62 = vpop.xlane.xlu0 %574 }
  0xea   : > { %v589_v0 = vmul.f32 0.0009765625, %v575_v62 }
  0xec   : > { %v1474_v3 = vpack.c.bf16 %v589_v0, %v588_v63 }
  0xed   : > { %v583_v4 = vpop.xlane.xlu1 %582 }
  0xee   : > { %1475 = vmatpush3.bf16.msra.mxu0 %v1474_v3  ;;  %v593_v5 = vmul.f32 0.0009765625, %v583_v4 }
  0xef   : > { %1476 = vmatprep.subr.bf16.mxu0 %v1706_v57 }
  0xf0   : > { %v581_v6 = vpop.xlane.xlu0 %580 }
  0xf1   : > { %v592_v7 = vmul.f32 0.0009765625, %v581_v6 }
  0xf2   : > { %1478 = vmatpush3.bf16.msra.mxu0 %v1477_v8 }
  0xf3   : > { %v1480_v10 = vpack.c.bf16 %v593_v5, %v592_v7  ;;  %1479 = vmatprep.subr.bf16.mxu0 %v1706_v57 }
  0xf4   : > { %v587_v9 = vpop.xlane.xlu1 %586 }
  0xf5   : > { %v595_v11 = vmul.f32 0.0009765625, %v587_v9 }
  0xf6   : > { %1481 = vmatpush3.bf16.msra.mxu0 %v1480_v10 }
  0xf7   : > { %1482 = vmatprep.subr.bf16.mxu0 %v1706_v57 }
  0xf8   : > { %v585_v12 = vpop.xlane.xlu0 %584 }
  0xf9   : > { %v594_v13 = vmul.f32 0.0009765625, %v585_v12 }
  0xfb   : > { %v1483_v14 = vpack.c.bf16 %v595_v11, %v594_v13 }
  0xfd   : > { %1484 = vmatpush3.bf16.msra.mxu0 %v1483_v14 }
 0x100   : > { %1452 = vmatmul.mubr.msk.f32.vlgmr.msra.gmra.mrb[0].mxu0 %vm598_vm1, %v596_v15 }
 0x1d3   : > { %v668_v18 = vpop.f32.mrb[0].mxu0 }
 0x1d4   : > { %v669_v19 = vadd.f32 %v668_v18, %v597_v17  ;;  %v1453_v20 = vpop.f32.mrb[1].mxu0 }
 0x1d6   : > { %1454 = vmatprep.subr.msk.mxu1 %vm713_vm3, %v669_v19 }
 0x1d7   : > { %1455 = vmatpush3.msk.msra.mxu1 %vm713_vm3, %v669_v19 }
 0x1d8   : > { %1457 = vmatmul.mubr.msk.f32.vlgmr.msra.gmra.mrb[0].mxu1 %vm688_vm2, %v673_v21  ;;  %1468 = vmatprep.subr.mxu1 %v1708_v58 }
 0x1d9   : > { %1469 = vmatpush3.msk.msra.mxu1 %vm713_vm3, %v669_v19  ;;  %1459 = vmatprep.mubr.msk.f32.mxu1 %vm688_vm2, %v674_v22 }
 0x1dc   : > { %1460 = vmatmul.mubr.msk.f32.gmra.mrb[2].mxu1 %vm688_vm2, %v675_v23 }
 0x1dd   : > { %1462 = vmatprep.mubr.msk.f32.mxu1 %vm688_vm2, %v676_v24 }
 0x1e0   : > { %1463 = vmatmul.mubr.msk.f32.gmra.mrb[4].mxu1 %vm688_vm2, %v677_v25 }
 0x1e1   : > { %1465 = vmatprep.mubr.msk.f32.mxu1 %vm688_vm2, %v678_v26 }
 0x1e4   : > { %1466 = vmatmul.mubr.msk.f32.gmra.mrb[6].mxu1 %vm688_vm2, %v679_v27 }
 0x1e5   : > { %1470 = vmatprep.mubr.msk.f32.mxu1 %vm1707_vm0, %v1708_v58 }
 0x1e8   : > { %1471 = vmatmul.mubr.msk.f32.vlgmr.msra.gmra.mrb[8].mxu1 %vm688_vm2, %v831_v28 }
 0x2ab   : > { %v1458_v32 = vpop.f32.mrb[0].mxu1 }
 0x2ac   : > { %v789_v31 = vadd.f32 %v1458_v32, %v681_v29  ;;  %v783_v33 = vpop.f32.mrb[1].mxu1 }
 0x2ad   : > { %v784_v34 = vadd.f32 %v783_v33, %v680_v30 }
 0x2ae   : > { %824 = vst.msk [vmem:[#allocation4 + $0x8] sm:$0xff] %vm822_vm4, %v789_v31 }
 0x2af   : > { %823 = vst.msk [vmem:[#allocation4] sm:$0xff] %vm822_vm4, %v784_v34  ;;  %v1461_v37 = vpop.f32.mrb[2].mxu1 }
 0x2b0   : > { %v799_v38 = vadd.f32 %v1461_v37, %v683_v35  ;;  %v793_v39 = vpop.f32.mrb[3].mxu1 }
 0x2b1   : > { %v794_v40 = vadd.f32 %v793_v39, %v682_v36 }
 0x2b2   : > { %826 = vst.msk [vmem:[#allocation4 + $0x18] sm:$0xff] %vm822_vm4, %v799_v38 }
 0x2b3   : > { %825 = vst.msk [vmem:[#allocation4 + $0x10] sm:$0xff] %vm822_vm4, %v794_v40  ;;  %v1464_v44 = vpop.f32.mrb[4].mxu1 }
 0x2b4   : > { %v809_v46 = vadd.f32 %v1464_v44, %v685_v41  ;;  %v803_v47 = vpop.f32.mrb[5].mxu1 }
 0x2b5   : > { %v804_v48 = vadd.f32 %v803_v47, %v684_v42 }
 0x2b6   : > { %828 = vst.msk [vmem:[#allocation4 + $0x28] sm:$0xff] %vm822_vm4, %v809_v46 }
 0x2b7   : > { %827 = vst.msk [vmem:[#allocation4 + $0x20] sm:$0xff] %vm822_vm4, %v804_v48  ;;  %v1467_v51 = vpop.f32.mrb[6].mxu1 }
 0x2b8   : > { %v819_v52 = vadd.f32 %v1467_v51, %v687_v49  ;;  %v813_v53 = vpop.f32.mrb[7].mxu1 }
 0x2b9   : > { %v814_v54 = vadd.f32 %v813_v53, %v686_v50 }
 0x2ba   : > { %830 = vst.msk [vmem:[#allocation4 + $0x38] sm:$0xff] %vm822_vm4, %v819_v52 }
 0x2bb   : > { %829 = vst.msk [vmem:[#allocation4 + $0x30] sm:$0xff] %vm822_vm4, %v814_v54  ;;  %v902_v57 = vpop.f32.mrb[8].mxu1 }
 0x2bc   : > { %v903_v58 = vadd.f32 %v902_v57, %v832_v55  ;;  %v1472_v59 = vpop.f32.mrb[9].mxu1 }
 0x2be   : > { %v909_v60 = vrot.slane %v903_v58, %v908_v56 }
 0x2c0   : > { %910 = vst.msk [vmem:[#allocation5] sm:$0xff] %vm822_vm4, %v909_v60  ;;  %911 = vst.msk [vmem:[#allocation5 + $0x8] sm:$0xff] %vm822_vm4, %v909_v60 }
 0x2c1   : > { %912 = vst.msk [vmem:[#allocation5 + $0x10] sm:$0xff] %vm822_vm4, %v909_v60  ;;  %913 = vst.msk [vmem:[#allocation5 + $0x18] sm:$0xff] %vm822_vm4, %v909_v60 }
 0x2c2   : > { %914 = vst.msk [vmem:[#allocation5 + $0x20] sm:$0xff] %vm822_vm4, %v909_v60  ;;  %915 = vst.msk [vmem:[#allocation5 + $0x28] sm:$0xff] %vm822_vm4, %v909_v60 }
 0x2c3   : > { %916 = vst.msk [vmem:[#allocation5 + $0x30] sm:$0xff] %vm822_vm4, %v909_v60  ;;  %917 = vst.msk [vmem:[#allocation5 + $0x38] sm:$0xff] %vm822_vm4, %v909_v60 }
 0x2c4 PF: > { %p1407_p9 = scmp.ne.s32.totalorder %s1685_s29, 1 }
 0x2c6   : > { %921 = sbr.rel (%p1407_p9) target bundleno = 898 (0x382), region = 68 }
 0x2cd   : > { %v988_v61 = vld [vmem:[#allocation4 + $0x10] sm:$0xff]  ;;  %v986_v62 = vld [vmem:[#allocation4] sm:$0xff]  ;;  %v1709_v63 = vmov 0   ;;  %v989_v0 = vld [vmem:[#allocation4 + $0x18] sm:$0xff] }
 0x2ce   : > { %1572 = vset.pattern.permute.xlu1 %v1709_v63  ;;  %1571 = vset.pattern.permute.xlu0 %v1709_v63  ;;  %v987_v1 = vld [vmem:[#allocation4 + $0x8] sm:$0xff]  ;;  %v990_v3 = vld [vmem:[#allocation4 + $0x20] sm:$0xff]  ;;  %v993_v4 = vld [vmem:[#allocation4 + $0x38] sm:$0xff] }
 0x2cf   : > { %1006 = vperm.xlu1 %1572, %v988_v61   ;;  %996 = vperm.xlu0 %1571, %v986_v62   ;;  %v991_v2 = vld [vmem:[#allocation4 + $0x28] sm:$0xff]  ;;  %v992_v5 = vld [vmem:[#allocation4 + $0x30] sm:$0xff]  ;;  %v1098_v7 = vld [vmem:[#allocation5] sm:$0xff] }
 0x2d0   : > { %v1099_v6 = vld [vmem:[#allocation5 + $0x8] sm:$0xff]  ;;  %v1101_v8 = vld [vmem:[#allocation5 + $0x18] sm:$0xff]  ;;  %v1100_v9 = vld [vmem:[#allocation5 + $0x10] sm:$0xff] }
 0x2d1   : > { %v1103_v10 = vld [vmem:[#allocation5 + $0x28] sm:$0xff]  ;;  %v1102_v11 = vld [vmem:[#allocation5 + $0x20] sm:$0xff]  ;;  %v1105_v12 = vld [vmem:[#allocation5 + $0x38] sm:$0xff] }
 0x2d2   : > { %v1104_v13 = vld [vmem:[#allocation5 + $0x30] sm:$0xff]  ;;  %v938_v14 = vld [vmem:[#allocation2 + $0x80] sm:$0xff]  ;;  %v939_v15 = vld [vmem:[#allocation2 + $0x88] sm:$0xff] }
 0x2d3   : > { %1011 = vperm.xlu1 %1572, %v989_v0   ;;  %1001 = vperm.xlu0 %1571, %v987_v1   ;;  %v940_v16 = vld [vmem:[#allocation2 + $0x90] sm:$0xff]  ;;  %v941_v17 = vld [vmem:[#allocation2 + $0x98] sm:$0xff]  ;;  %v942_v18 = vld [vmem:[#allocation2 + $0xa0] sm:$0xff] }
 0x2d4   : > { %v943_v19 = vld [vmem:[#allocation2 + $0xa8] sm:$0xff]  ;;  %v944_v20 = vld [vmem:[#allocation2 + $0xb0] sm:$0xff]  ;;  %v945_v21 = vld [vmem:[#allocation2 + $0xb8] sm:$0xff] }
 0x2d5   : > { %v922_v22 = vld [vmem:[#allocation2] sm:$0xff]  ;;  %v923_v23 = vld [vmem:[#allocation2 + $0x8] sm:$0xff]  ;;  %v924_v24 = vld [vmem:[#allocation2 + $0x10] sm:$0xff] }
 0x2d6   : > { %v925_v25 = vld [vmem:[#allocation2 + $0x18] sm:$0xff]  ;;  %v926_v26 = vld [vmem:[#allocation2 + $0x20] sm:$0xff]  ;;  %v927_v27 = vld [vmem:[#allocation2 + $0x28] sm:$0xff] }
 0x2d7   : > { %1021 = vperm.xlu1 %1572, %v991_v2   ;;  %1016 = vperm.xlu0 %1571, %v990_v3   ;;  %v928_v28 = vld [vmem:[#allocation2 + $0x30] sm:$0xff]  ;;  %v929_v29 = vld [vmem:[#allocation2 + $0x38] sm:$0xff]  ;;  %v946_v31 = vld [vmem:[#allocation2 + $0xc0] sm:$0xff] }
 0x2d8   : > { %v947_v33 = vld [vmem:[#allocation2 + $0xc8] sm:$0xff]  ;;  %v948_v34 = vld [vmem:[#allocation2 + $0xd0] sm:$0xff]  ;;  %v949_v35 = vld [vmem:[#allocation2 + $0xd8] sm:$0xff] }
 0x2d9   : > { %v950_v40 = vld [vmem:[#allocation2 + $0xe0] sm:$0xff]  ;;  %v951_v41 = vld [vmem:[#allocation2 + $0xe8] sm:$0xff]  ;;  %v952_v42 = vld [vmem:[#allocation2 + $0xf0] sm:$0xff] }
 0x2da   : > { %v953_v43 = vld [vmem:[#allocation2 + $0xf8] sm:$0xff]  ;;  %v930_v49 = vld [vmem:[#allocation2 + $0x40] sm:$0xff]  ;;  %v931_v50 = vld [vmem:[#allocation2 + $0x48] sm:$0xff] }
 0x2db   : > { %1031 = vperm.xlu1 %1572, %v993_v4   ;;  %1026 = vperm.xlu0 %1571, %v992_v5   ;;  %v932_v45 = vld [vmem:[#allocation2 + $0x50] sm:$0xff]  ;;  %v933_v51 = vld [vmem:[#allocation2 + $0x58] sm:$0xff]  ;;  %v934_v56 = vld [vmem:[#allocation2 + $0x60] sm:$0xff] }
 0x2dc   : > { %v935_v57 = vld [vmem:[#allocation2 + $0x68] sm:$0xff]  ;;  %v936_v58 = vld [vmem:[#allocation2 + $0x70] sm:$0xff]  ;;  %v937_v59 = vld [vmem:[#allocation2 + $0x78] sm:$0xff] }
 0x2dd   : > { %v962_v2 = vld [vmem:[#allocation2 + $0x140] sm:$0xff]  ;;  %v963_v3 = vld [vmem:[#allocation2 + $0x148] sm:$0xff]  ;;  %v964_v4 = vld [vmem:[#allocation2 + $0x150] sm:$0xff] }
 0x2de   : > { %v965_v5 = vld [vmem:[#allocation2 + $0x158] sm:$0xff] }
 0x2df   : > { %1113 = vperm.xlu1 %1572, %v1099_v6   ;;  %1108 = vperm.xlu0 %1571, %v1098_v7  }
 0x2e3   : > { %1123 = vperm.xlu1 %1572, %v1101_v8   ;;  %1118 = vperm.xlu0 %1571, %v1100_v9  }
 0x2e7   : > { %1133 = vperm.xlu1 %1572, %v1103_v10   ;;  %1128 = vperm.xlu0 %1571, %v1102_v11   ;;  %v966_v10 = vld [vmem:[#allocation2 + $0x160] sm:$0xff]  ;;  %v967_v11 = vld [vmem:[#allocation2 + $0x168] sm:$0xff] }
 0x2eb   : > { %1143 = vperm.xlu1 %1572, %v1105_v12   ;;  %1138 = vperm.xlu0 %1571, %v1104_v13   ;;  %v968_v12 = vld [vmem:[#allocation2 + $0x170] sm:$0xff]  ;;  %v969_v13 = vld [vmem:[#allocation2 + $0x178] sm:$0xff] }
 0x34e   : > { %v1007_v30 = vpop.permute.xlu1 %1006  ;;  %v997_v32 = vpop.permute.xlu0 %996 }
 0x34f   : > { %v2099_v36 = vmul.f32 %v1007_v30, %v938_v14  ;;  %v2101_v37 = vmul.f32 %v1007_v30, %v939_v15  ;;  %v2103_v38 = vmul.f32 %v1007_v30, %v940_v16  ;;  %v2105_v39 = vmul.f32 %v1007_v30, %v941_v17 }
 0x350   : > { %v2107_v44 = vmul.f32 %v1007_v30, %v942_v18  ;;  %v2109_v46 = vmul.f32 %v1007_v30, %v943_v19  ;;  %v2111_v47 = vmul.f32 %v1007_v30, %v944_v20  ;;  %v2113_v48 = vmul.f32 %v1007_v30, %v945_v21  ;;  %v954_v18 = vld [vmem:[#allocation2 + $0x100] sm:$0xff]  ;;  %v955_v19 = vld [vmem:[#allocation2 + $0x108] sm:$0xff]  ;;  %v956_v20 = vld [vmem:[#allocation2 + $0x110] sm:$0xff] }
 0x351   : > { %v2115_v52 = vmul.f32 %v997_v32, %v922_v22  ;;  %v2117_v53 = vmul.f32 %v997_v32, %v923_v23  ;;  %v2119_v54 = vmul.f32 %v997_v32, %v924_v24  ;;  %v2121_v55 = vmul.f32 %v997_v32, %v925_v25  ;;  %v957_v25 = vld [vmem:[#allocation2 + $0x118] sm:$0xff] }
 0x352   : > { %v2123_v60 = vmul.f32 %v997_v32, %v926_v26  ;;  %v2125_v61 = vmul.f32 %v997_v32, %v927_v27  ;;  %v2127_v62 = vmul.f32 %v997_v32, %v928_v28  ;;  %v2129_v63 = vmul.f32 %v997_v32, %v929_v29  ;;  %v1012_v0 = vpop.permute.xlu1 %1011  ;;  %v1002_v1 = vpop.permute.xlu0 %1001  ;;  %v958_v26 = vld [vmem:[#allocation2 + $0x120] sm:$0xff]  ;;  %v959_v27 = vld [vmem:[#allocation2 + $0x128] sm:$0xff] }
 0x353   : > { %v2131_v6 = vmul.f32 %v1012_v0, %v946_v31  ;;  %v2133_v7 = vmul.f32 %v1012_v0, %v947_v33  ;;  %v2135_v8 = vmul.f32 %v1012_v0, %v948_v34  ;;  %v2137_v9 = vmul.f32 %v1012_v0, %v949_v35  ;;  %v960_v34 = vld [vmem:[#allocation2 + $0x130] sm:$0xff]  ;;  %v961_v35 = vld [vmem:[#allocation2 + $0x138] sm:$0xff] }
 0x354   : > { %v2139_v14 = vmul.f32 %v1012_v0, %v950_v40  ;;  %v2141_v15 = vmul.f32 %v1012_v0, %v951_v41  ;;  %v2143_v16 = vmul.f32 %v1012_v0, %v952_v42  ;;  %v2145_v17 = vmul.f32 %v1012_v0, %v953_v43  ;;  %v978_v40 = vld [vmem:[#allocation2 + $0x1c0] sm:$0xff] }
 0x355   : > { %v2147_v21 = vmul.f32 %v1002_v1, %v930_v49  ;;  %v2149_v22 = vmul.f32 %v1002_v1, %v931_v50  ;;  %v2151_v23 = vmul.f32 %v1002_v1, %v932_v45  ;;  %v2153_v24 = vmul.f32 %v1002_v1, %v933_v51  ;;  %v979_v50 = vld [vmem:[#allocation2 + $0x1c8] sm:$0xff]  ;;  %v980_v45 = vld [vmem:[#allocation2 + $0x1d0] sm:$0xff]  ;;  %v981_v51 = vld [vmem:[#allocation2 + $0x1d8] sm:$0xff] }
 0x356   : > { %v2155_v28 = vmul.f32 %v1002_v1, %v934_v56  ;;  %v2157_v29 = vmul.f32 %v1002_v1, %v935_v57  ;;  %v2159_v30 = vmul.f32 %v1002_v1, %v936_v58  ;;  %v2161_v32 = vmul.f32 %v1002_v1, %v937_v59  ;;  %v1022_v31 = vpop.permute.xlu1 %1021  ;;  %v1017_v33 = vpop.permute.xlu0 %1016  ;;  %v982_v0 = vld [vmem:[#allocation2 + $0x1e0] sm:$0xff]  ;;  %v983_v1 = vld [vmem:[#allocation2 + $0x1e8] sm:$0xff] }
 0x357   : > { %v2163_v41 = vmul.f32 %v1022_v31, %v962_v2  ;;  %v2165_v42 = vmul.f32 %v1022_v31, %v963_v3  ;;  %v2167_v43 = vmul.f32 %v1022_v31, %v964_v4  ;;  %v2169_v49 = vmul.f32 %v1022_v31, %v965_v5  ;;  %v984_v2 = vld [vmem:[#allocation2 + $0x1f0] sm:$0xff] }
 0x358   : > { %v2171_v56 = vmul.f32 %v1022_v31, %v966_v10  ;;  %v2173_v57 = vmul.f32 %v1022_v31, %v967_v11  ;;  %v2175_v58 = vmul.f32 %v1022_v31, %v968_v12  ;;  %v2177_v59 = vmul.f32 %v1022_v31, %v969_v13  ;;  %v970_v10 = vld [vmem:[#allocation2 + $0x180] sm:$0xff] }
 0x359   : > { %2433 = vst [vmem:[#allocation14_spill] sm:$0xff] %v2167_v43  ;;  %2434 = vst [vmem:[#allocation15_spill] sm:$0xff] %v2169_v49  ;;  %v2179_v3 = vmul.f32 %v1017_v33, %v954_v18  ;;  %v2181_v4 = vmul.f32 %v1017_v33, %v955_v19  ;;  %v2183_v5 = vmul.f32 %v1017_v33, %v956_v20  ;;  %v985_v43 = vld [vmem:[#allocation2 + $0x1f8] sm:$0xff] }
 0x35a   : > { %2435 = vst [vmem:[#allocation16_spill] sm:$0xff] %v2171_v56  ;;  %2436 = vst [vmem:[#allocation17_spill] sm:$0xff] %v2177_v59  ;;  %v2185_v49 = vmul.f32 %v1017_v33, %v957_v25  ;;  %v971_v56 = vld [vmem:[#allocation2 + $0x188] sm:$0xff]  ;;  %v2187_v11 = vmul.f32 %v1017_v33, %v958_v26  ;;  %v2189_v12 = vmul.f32 %v1017_v33, %v959_v27  ;;  %v1032_v59 = vpop.permute.xlu1 %1031  ;;  %v1027_v18 = vpop.permute.xlu0 %1026  ;;  %v973_v19 = vld [vmem:[#allocation2 + $0x198] sm:$0xff] }
 0x35b   : > { %2437 = vst [vmem:[#allocation18_spill] sm:$0xff] %v2179_v3  ;;  %2438 = vst [vmem:[#allocation19_spill] sm:$0xff] %v2181_v4  ;;  %v2191_v13 = vmul.f32 %v1017_v33, %v960_v34  ;;  %v2193_v31 = vmul.f32 %v1017_v33, %v961_v35  ;;  %v972_v3 = vld [vmem:[#allocation2 + $0x190] sm:$0xff]  ;;  %v974_v4 = vld [vmem:[#allocation2 + $0x1a0] sm:$0xff]  ;;  %v2195_v20 = vmul.f32 %v1032_v59, %v978_v40 }
 0x35c   : > { %2439 = vst [vmem:[#allocation20_spill] sm:$0xff] %v2183_v5  ;;  %2440 = vst [vmem:[#allocation21_spill] sm:$0xff] %v2185_v49  ;;  %v2197_v25 = vmul.f32 %v1032_v59, %v979_v50  ;;  %v2199_v49 = vmul.f32 %v1032_v59, %v980_v45  ;;  %v2201_v5 = vmul.f32 %v1032_v59, %v981_v51  ;;  %v975_v26 = vld [vmem:[#allocation2 + $0x1a8] sm:$0xff]  ;;  %v976_v27 = vld [vmem:[#allocation2 + $0x1b0] sm:$0xff] }
 0x35d   : > { %2441 = vst [vmem:[#allocation22_spill] sm:$0xff] %v2189_v12  ;;  %2442 = vst [vmem:[#allocation23_spill] sm:$0xff] %v2191_v13  ;;  %v977_v12 = vld [vmem:[#allocation2 + $0x1b8] sm:$0xff]  ;;  %v2203_v34 = vmul.f32 %v1032_v59, %v982_v0  ;;  %v2205_v33 = vmul.f32 %v1032_v59, %v983_v1  ;;  %v2207_v35 = vmul.f32 %v1032_v59, %v984_v2 }
 0x35e   : > { %2443 = vst [vmem:[#allocation24_spill] sm:$0xff] %v2193_v31  ;;  %v2209_v31 = vmul.f32 %v1032_v59, %v985_v43  ;;  %v2211_v13 = vmul.f32 %v1027_v18, %v970_v10  ;;  %v2213_v40 = vmul.f32 %v1027_v18, %v971_v56  ;;  %v2215_v50 = vmul.f32 %v1027_v18, %v972_v3  ;;  %v1114_v51 = vpop.permute.xlu1 %1113  ;;  %v1109_v0 = vpop.permute.xlu0 %1108 }
 0x35f   : > { %v2217_v45 = vmul.f32 %v1027_v18, %v973_v19  ;;  %v2219_v1 = vmul.f32 %v1027_v18, %v974_v4  ;;  %v2221_v2 = vmul.f32 %v1027_v18, %v975_v26  ;;  %v2223_v43 = vmul.f32 %v1027_v18, %v976_v27 }
 0x360   : > { %v2225_v59 = vmul.f32 %v1027_v18, %v977_v12  ;;  %v1154_v56 = vadd.f32 %v1114_v51, %v2147_v21  ;;  %v1155_v3 = vadd.f32 %v1114_v51, %v2149_v22  ;;  %v1156_v10 = vadd.f32 %v1114_v51, %v2151_v23 }
 0x361   : > { %v1157_v19 = vadd.f32 %v1114_v51, %v2153_v24  ;;  %v1158_v4 = vadd.f32 %v1114_v51, %v2155_v28  ;;  %v1159_v26 = vadd.f32 %v1114_v51, %v2157_v29  ;;  %v1160_v27 = vadd.f32 %v1114_v51, %v2159_v30 }
 0x362   : > { %v1161_v12 = vadd.f32 %v1114_v51, %v2161_v32  ;;  %1218 = vst [vmem:[%s1891_s13 + $0x40] sm:$0xff] %v1154_v56  ;;  %1219 = vst [vmem:[%s1891_s13 + $0x48] sm:$0xff] %v1155_v3  ;;  %v1146_v21 = vadd.f32 %v1109_v0, %v2115_v52  ;;  %v1147_v22 = vadd.f32 %v1109_v0, %v2117_v53  ;;  %v1124_v30 = vpop.permute.xlu1 %1123 }
 0x363   : > { %1220 = vst [vmem:[%s1891_s13 + $0x50] sm:$0xff] %v1156_v10  ;;  %1221 = vst [vmem:[%s1891_s13 + $0x58] sm:$0xff] %v1157_v19  ;;  %v1148_v23 = vadd.f32 %v1109_v0, %v2119_v54  ;;  %v1149_v24 = vadd.f32 %v1109_v0, %v2121_v55  ;;  %v1150_v28 = vadd.f32 %v1109_v0, %v2123_v60  ;;  %v1119_v54 = vpop.permute.xlu0 %1118  ;;  %v2447_v10 = vld [vmem:[#allocation17_spill] sm:$0xff]  ;;  %v2448_v19 = vld [vmem:[#allocation18_spill] sm:$0xff] }
 0x364   : > { %1222 = vst [vmem:[%s1891_s13 + $0x60] sm:$0xff] %v1158_v4  ;;  %1223 = vst [vmem:[%s1891_s13 + $0x68] sm:$0xff] %v1159_v26  ;;  %v1151_v29 = vadd.f32 %v1109_v0, %v2125_v61  ;;  %v1152_v52 = vadd.f32 %v1109_v0, %v2127_v62  ;;  %v1153_v53 = vadd.f32 %v1109_v0, %v2129_v63  ;;  %v2445_v0 = vld [vmem:[#allocation15_spill] sm:$0xff] }
 0x365   : > { %1224 = vst [vmem:[%s1891_s13 + $0x70] sm:$0xff] %v1160_v27  ;;  %1225 = vst [vmem:[%s1891_s13 + $0x78] sm:$0xff] %v1161_v12  ;;  %v1170_v55 = vadd.f32 %v1124_v30, %v2131_v6  ;;  %v1171_v60 = vadd.f32 %v1124_v30, %v2133_v7  ;;  %v1172_v61 = vadd.f32 %v1124_v30, %v2135_v8  ;;  %v2449_v26 = vld [vmem:[#allocation19_spill] sm:$0xff]  ;;  %v2450_v12 = vld [vmem:[#allocation20_spill] sm:$0xff] }
 0x366   : > { %1210 = vst [vmem:[%s1891_s13] sm:$0xff] %v1146_v21  ;;  %1211 = vst [vmem:[%s1891_s13 + $0x8] sm:$0xff] %v1147_v22  ;;  %v1173_v62 = vadd.f32 %v1124_v30, %v2137_v9  ;;  %v1174_v63 = vadd.f32 %v1124_v30, %v2139_v14  ;;  %v1175_v32 = vadd.f32 %v1124_v30, %v2141_v15  ;;  %v1134_v18 = vpop.permute.xlu1 %1133  ;;  %v2451_v22 = vld [vmem:[#allocation21_spill] sm:$0xff] }
 0x367   : > { %1212 = vst [vmem:[%s1891_s13 + $0x10] sm:$0xff] %v1148_v23  ;;  %1213 = vst [vmem:[%s1891_s13 + $0x18] sm:$0xff] %v1149_v24  ;;  %v1176_v6 = vadd.f32 %v1124_v30, %v2143_v16  ;;  %v1177_v7 = vadd.f32 %v1124_v30, %v2145_v17  ;;  %v1162_v8 = vadd.f32 %v1119_v54, %v2099_v36  ;;  %v2452_v23 = vld [vmem:[#allocation22_spill] sm:$0xff] }
 0x368   : > { %1214 = vst [vmem:[%s1891_s13 + $0x20] sm:$0xff] %v1150_v28  ;;  %1215 = vst [vmem:[%s1891_s13 + $0x28] sm:$0xff] %v1151_v29  ;;  %v1163_v9 = vadd.f32 %v1119_v54, %v2101_v37  ;;  %v1164_v14 = vadd.f32 %v1119_v54, %v2103_v38  ;;  %v1165_v15 = vadd.f32 %v1119_v54, %v2105_v39  ;;  %v1129_v38 = vpop.permute.xlu0 %1128  ;;  %v2453_v28 = vld [vmem:[#allocation23_spill] sm:$0xff] }
 0x369   : > { %1216 = vst [vmem:[%s1891_s13 + $0x30] sm:$0xff] %v1152_v52  ;;  %1217 = vst [vmem:[%s1891_s13 + $0x38] sm:$0xff] %v1153_v53  ;;  %v1166_v16 = vadd.f32 %v1119_v54, %v2107_v44  ;;  %v1167_v17 = vadd.f32 %v1119_v54, %v2109_v46  ;;  %v1168_v36 = vadd.f32 %v1119_v54, %v2111_v47  ;;  %v2444_v46 = vld [vmem:[#allocation14_spill] sm:$0xff]  ;;  %v2454_v52 = vld [vmem:[#allocation24_spill] sm:$0xff] }
 0x36a   : > { %1234 = vst [vmem:[%s1891_s13 + $0xc0] sm:$0xff] %v1170_v55  ;;  %1235 = vst [vmem:[%s1891_s13 + $0xc8] sm:$0xff] %v1171_v60  ;;  %v1169_v37 = vadd.f32 %v1119_v54, %v2113_v48  ;;  %v1186_v39 = vadd.f32 %v1134_v18, %v2163_v41  ;;  %v1187_v44 = vadd.f32 %v1134_v18, %v2165_v42  ;;  %v2446_v48 = vld [vmem:[#allocation16_spill] sm:$0xff]  ;;  %v1144_v30 = vpop.permute.xlu1 %1143 }
 0x36b   : > { %1236 = vst [vmem:[%s1891_s13 + $0xd0] sm:$0xff] %v1172_v61  ;;  %1237 = vst [vmem:[%s1891_s13 + $0xd8] sm:$0xff] %v1173_v62  ;;  %v1188_v51 = vadd.f32 %v1134_v18, %v2444_v46  ;;  %v1189_v47 = vadd.f32 %v1134_v18, %v2445_v0  ;;  %v1190_v56 = vadd.f32 %v1134_v18, %v2446_v48 }
 0x36c   : > { %1238 = vst [vmem:[%s1891_s13 + $0xe0] sm:$0xff] %v1174_v63  ;;  %1239 = vst [vmem:[%s1891_s13 + $0xe8] sm:$0xff] %v1175_v32  ;;  %v1191_v3 = vadd.f32 %v1134_v18, %v2173_v57  ;;  %v1192_v41 = vadd.f32 %v1134_v18, %v2175_v58  ;;  %v1193_v42 = vadd.f32 %v1134_v18, %v2447_v10  ;;  %v1139_v54 = vpop.permute.xlu0 %1138 }
 0x36d   : > { %1240 = vst [vmem:[%s1891_s13 + $0xf0] sm:$0xff] %v1176_v6  ;;  %1241 = vst [vmem:[%s1891_s13 + $0xf8] sm:$0xff] %v1177_v7  ;;  %v1178_v4 = vadd.f32 %v1129_v38, %v2448_v19  ;;  %v1179_v27 = vadd.f32 %v1129_v38, %v2449_v26  ;;  %v1180_v21 = vadd.f32 %v1129_v38, %v2450_v12 }
 0x36e   : > { %1226 = vst [vmem:[%s1891_s13 + $0x80] sm:$0xff] %v1162_v8  ;;  %1227 = vst [vmem:[%s1891_s13 + $0x88] sm:$0xff] %v1163_v9  ;;  %v1181_v57 = vadd.f32 %v1129_v38, %v2451_v22  ;;  %v1182_v58 = vadd.f32 %v1129_v38, %v2187_v11  ;;  %v1183_v24 = vadd.f32 %v1129_v38, %v2452_v23 }
 0x36f   : > { %1228 = vst [vmem:[%s1891_s13 + $0x90] sm:$0xff] %v1164_v14  ;;  %1229 = vst [vmem:[%s1891_s13 + $0x98] sm:$0xff] %v1165_v15  ;;  %v1184_v29 = vadd.f32 %v1129_v38, %v2453_v28  ;;  %v1185_v53 = vadd.f32 %v1129_v38, %v2454_v52  ;;  %v1202_v11 = vadd.f32 %v1144_v30, %v2195_v20 }
 0x370   : > { %1230 = vst [vmem:[%s1891_s13 + $0xa0] sm:$0xff] %v1166_v16  ;;  %1231 = vst [vmem:[%s1891_s13 + $0xa8] sm:$0xff] %v1167_v17  ;;  %v1203_v55 = vadd.f32 %v1144_v30, %v2197_v25  ;;  %v1204_v60 = vadd.f32 %v1144_v30, %v2199_v49  ;;  %v1205_v61 = vadd.f32 %v1144_v30, %v2201_v5 }
 0x371   : > { %1232 = vst [vmem:[%s1891_s13 + $0xb0] sm:$0xff] %v1168_v36  ;;  %1233 = vst [vmem:[%s1891_s13 + $0xb8] sm:$0xff] %v1169_v37  ;;  %v1206_v62 = vadd.f32 %v1144_v30, %v2203_v34  ;;  %v1207_v63 = vadd.f32 %v1144_v30, %v2205_v33  ;;  %v1208_v20 = vadd.f32 %v1144_v30, %v2207_v35 }
 0x372   : > { %1250 = vst [vmem:[%s1891_s13 + $0x140] sm:$0xff] %v1186_v39  ;;  %1251 = vst [vmem:[%s1891_s13 + $0x148] sm:$0xff] %v1187_v44  ;;  %v1209_v25 = vadd.f32 %v1144_v30, %v2209_v31  ;;  %v1194_v49 = vadd.f32 %v1139_v54, %v2211_v13  ;;  %v1195_v5 = vadd.f32 %v1139_v54, %v2213_v40 }
 0x373   : > { %1252 = vst [vmem:[%s1891_s13 + $0x150] sm:$0xff] %v1188_v51  ;;  %1253 = vst [vmem:[%s1891_s13 + $0x158] sm:$0xff] %v1189_v47  ;;  %v1196_v34 = vadd.f32 %v1139_v54, %v2215_v50  ;;  %v1197_v33 = vadd.f32 %v1139_v54, %v2217_v45  ;;  %v1198_v31 = vadd.f32 %v1139_v54, %v2219_v1 }
 0x374   : > { %1254 = vst [vmem:[%s1891_s13 + $0x160] sm:$0xff] %v1190_v56  ;;  %1255 = vst [vmem:[%s1891_s13 + $0x168] sm:$0xff] %v1191_v3  ;;  %v1199_v35 = vadd.f32 %v1139_v54, %v2221_v2  ;;  %v1200_v13 = vadd.f32 %v1139_v54, %v2223_v43  ;;  %v1201_v32 = vadd.f32 %v1139_v54, %v2225_v59 }
 0x375   : > { %1256 = vst [vmem:[%s1891_s13 + $0x170] sm:$0xff] %v1192_v41  ;;  %1257 = vst [vmem:[%s1891_s13 + $0x178] sm:$0xff] %v1193_v42 }
 0x376   : > { %1242 = vst [vmem:[%s1891_s13 + $0x100] sm:$0xff] %v1178_v4  ;;  %1243 = vst [vmem:[%s1891_s13 + $0x108] sm:$0xff] %v1179_v27 }
 0x377   : > { %1244 = vst [vmem:[%s1891_s13 + $0x110] sm:$0xff] %v1180_v21  ;;  %1245 = vst [vmem:[%s1891_s13 + $0x118] sm:$0xff] %v1181_v57 }
 0x378   : > { %1246 = vst [vmem:[%s1891_s13 + $0x120] sm:$0xff] %v1182_v58  ;;  %1247 = vst [vmem:[%s1891_s13 + $0x128] sm:$0xff] %v1183_v24 }
 0x379   : > { %1248 = vst [vmem:[%s1891_s13 + $0x130] sm:$0xff] %v1184_v29  ;;  %1249 = vst [vmem:[%s1891_s13 + $0x138] sm:$0xff] %v1185_v53 }
 0x37a   : > { %1266 = vst [vmem:[%s1891_s13 + $0x1c0] sm:$0xff] %v1202_v11  ;;  %1267 = vst [vmem:[%s1891_s13 + $0x1c8] sm:$0xff] %v1203_v55 }
 0x37b   : > { %1268 = vst [vmem:[%s1891_s13 + $0x1d0] sm:$0xff] %v1204_v60  ;;  %1269 = vst [vmem:[%s1891_s13 + $0x1d8] sm:$0xff] %v1205_v61 }
 0x37c   : > { %1270 = vst [vmem:[%s1891_s13 + $0x1e0] sm:$0xff] %v1206_v62  ;;  %1271 = vst [vmem:[%s1891_s13 + $0x1e8] sm:$0xff] %v1207_v63 }
 0x37d   : > { %1272 = vst [vmem:[%s1891_s13 + $0x1f0] sm:$0xff] %v1208_v20  ;;  %1273 = vst [vmem:[%s1891_s13 + $0x1f8] sm:$0xff] %v1209_v25 }
 0x37e   : > { %1258 = vst [vmem:[%s1891_s13 + $0x180] sm:$0xff] %v1194_v49  ;;  %1259 = vst [vmem:[%s1891_s13 + $0x188] sm:$0xff] %v1195_v5 }
 0x37f   : > { %1260 = vst [vmem:[%s1891_s13 + $0x190] sm:$0xff] %v1196_v34  ;;  %1261 = vst [vmem:[%s1891_s13 + $0x198] sm:$0xff] %v1197_v33 }
 0x380   : > { %1262 = vst [vmem:[%s1891_s13 + $0x1a0] sm:$0xff] %v1198_v31  ;;  %1263 = vst [vmem:[%s1891_s13 + $0x1a8] sm:$0xff] %v1199_v35 }
 0x381   : > { %1264 = vst [vmem:[%s1891_s13 + $0x1b0] sm:$0xff] %v1200_v13  ;;  %1265 = vst [vmem:[%s1891_s13 + $0x1b8] sm:$0xff] %v1201_v32 }
 0x382 PF: > { %s1414_s29 = sshll.u32 %s1689_s30, 13  ;;  %s1291_s10 = sshll.u32 %s1891_s13, 4  ;;  %s2362_s10 = int_to_ptr.vmem [resolvable:$true] %s1291_s10 }
 0x383   : > { %s2359_s16 = scalar_lea.hbm %s2423_s7, %s1414_s29  ;;  %s1275_s18 = scalar_lea.sflag [#allocation9], %s1881_s11 }
 0x384   : > { %s1603_s14 = scalar_lea.vmem %s2362_s10, 8192  ;;  %p2455_p0 = scmp.ne.s32.totalorder %s2429_s17, 0 }
 0x385   : > { %p1604_p11 = scmp.ne.s32.totalorder %s2362_s10, %s1603_s14  ;;  %s1710_s25 = smov [#allocation10]  }
 0x386   : > { %s1607_s23 = sshll.u32 %s1710_s25, 4  ;;  %s1608_s23 = int_to_ptr.vmem [resolvable:$false] %s1607_s23 }
 0x387   : > { %p1605_p12 = pnand %p1604_p11, %p2455_p0  ;;  %s1609_s30 = scalar_lea.vmem %s1608_s23, 16384 }
 0x388   : > { %p1610_p2 = scmp.lt.s32.totalorder %s2362_s10, %s1608_s23  ;;  %p1611_p5 = scmp.lt.s32.totalorder %s1609_s30, %s1603_s14 }
 0x389   : > { %p1606_p13 = pneg %p1605_p12 }
 0x38a   : > { %p1612_p3 = por %p1611_p5, %p1610_p2 }
 0x38c   : > { %p1613_p7 = pnand %p1612_p3, %p1606_p13 }
 0x38e   : > { %1616 = shalt.err (!%p1613_p7)
}
 0x38f   : > { %s1617_s13 = scalar_lea.hbm %s2359_s16, 8192  ;;  %s1621_s29 = scalar_lea.hbm %s2423_s7, 16384 }
 0x390   : > { %p1618_p8 = scmp.ne.s32.totalorder %s2359_s16, %s1617_s13  ;;  %p1622_p6 = scmp.lt.u32.totalorder %s2359_s16, %s2423_s7 }
 0x391   : > { %p1623_p10 = scmp.lt.u32.totalorder %s1621_s29, %s1617_s13  ;;  %p1625_p11 = scmp.lt.u32.totalorder %s1617_s13, %s2359_s16 }
 0x392   : > { %p1619_p1 = pnand %p1618_p8, %p2455_p0 }
 0x393   : > { %p1624_p9 = por %p1623_p10, %p1622_p6 }
 0x394   : > { %p1620_p4 = pneg %p1619_p1 }
 0x395   : > { %p1626_p12 = por %p1625_p11, %p1624_p9 }
 0x397   : > { %p1627_p13 = pnand %p1626_p12, %p1620_p4 }
 0x399   : > { %1630 = shalt.err (!%p1627_p13)
}
 0x39a   : > { %s1711_s14 = smov 1024   ;;  %s1712_s25 = smov 64  }
 0x39b   : > { %1487 = dma.vmem_to_hbm [thread:$0]  (%p2455_p0), %s2362_s10, 8192, %s2359_s16, %s1275_s18, %s1711_s14, %s1711_s14, %s1712_s25  }
 0x39c PF: > { %p1498_p2 = scmp.ge.s32.totalorder %s1701_s6, 2  ;;  %s1306_s23 = sand.u32 1, %s1673_s26  }
 0x39d   : > { %p2456_p5 = scmp.ne.s32.totalorder %s2430_s19, 0  ;;  %s1307_s30 = scalar_lea.sflag [#allocation9], %s1306_s23 }
 0x39f   : > { %p1494_p3 = pnand %p1498_p2, %p2456_p5 }
 0x3a1   : > { %1668 = dma.done.wait (!%p1494_p3), %s1307_s30, 8192  }
 0x3a2   : > { %1670 = vsyncadd (!%p1494_p3), %s1307_s30, 4294959104  ;;  %s25_s6 = sadd.s32 1, %s1701_s6   ;;  %s2457_s17 = sld [smem:[#allocation13_spill]] }
 0x3a3   : > { %p22_p7 = scmp.ge.s32.totalorder %s25_s6, 6   ;;  %s2458_s26 = smov %s1677_s27 }
 0x3a4   : > { %s2459_s27 = smov %s1681_s28  ;;  %s2460_s28 = smov %s1832_s21 }
 0x3a5   : > { %s2461_s29 = smov %s1693_s8  ;;  %s2462_s30 = smov %s1697_s9 }
 0x3a6   : > { %s2463_s8 = smov %s2466_s12  ;;  %24 = sbr.rel (!%p22_p7) target bundleno = 10 (0xa), region = 109 }
 0x3a8   : > { %s2464_s9 = smov %s2457_s17 }
 0x3ad   :  { %1312 = vsyncpa [#allocation8], 1 }
 0x3ae   :  { %1314 = vsyncpa [#allocation8 + $0x1], 1 }
 0x3af   :  { %1315 = vsyncpa [#allocation9], 1 }
 0x3b0   :  { %1317 = vsyncpa [#allocation9 + $0x1], 1 }

</bundles_post_ra>
